<compile_context>
chip_gen: v7x
topology: tpu7x:2x2x1
jax: 0.10.0
libtpu: 0.0.40
codegen_flags: <defaults>
</compile_context>

<pallas_src>
import functools

import jax
import jax.numpy as jnp
import numpy as np
from jax.experimental import pallas as pl
from jax.experimental.pallas import tpu as pltpu


def _round_up(x, m):
    return ((x + m - 1) // m) * m


def _cdiv(a, b):
    return (a + b - 1) // b


def _vmem_limit(est_bytes):
    # Leave headroom on v7x (64 MiB VMEM/TC); never claim the full budget.
    return int(min(48 * 2**20, max(int(1.8 * est_bytes), 16 * 2**20)))


# ---------------------------------------------------------------------------
# Kernel 1: direct 3x3 stride-1 conv + folded-BN shift (+ residual) (+ ReLU)
# ---------------------------------------------------------------------------
def _make_direct3x3_kernel(Wp, tm, has_residual, apply_relu):
    offs = [kh * Wp + kw for kh in range(3) for kw in range(3)]  # static shifts

    def kernel(xc_ref, xh_ref, w_ref, shift_ref, *rest):
        if has_residual:
            res_ref, o_ref = rest
        else:
            (o_ref,) = rest
        # rows [m0, m0+tm) plus halo rows [m0+tm, m0+tm+hb) of the same array
        xcat = jnp.concatenate([xc_ref[...], xh_ref[...]], axis=0)
        acc = None
        for t, d in enumerate(offs):
            part = jnp.dot(xcat[d:d + tm, :], w_ref[t],
                           preferred_element_type=jnp.float32)
            acc = part if acc is None else acc + part
        y = acc + shift_ref[...]                    # BN scale already in weights
        if has_residual:
            y = y + res_ref[...].astype(jnp.float32)
        if apply_relu:
            y = jnp.maximum(y, 0.0)
        o_ref[...] = y.astype(o_ref.dtype)

    return kernel


def conv3x3_s1_bn(x_nhwc, w_hwio, scale, shift, residual=None, relu=True,
                  out_dtype=jnp.bfloat16):
    """3x3 / stride 1 / pad 1 conv + folded BN (+ residual) (+ ReLU), no im2col."""
    N, H, W, Cin = x_nhwc.shape
    Cout = w_hwio.shape[-1]
    Ho, Wo = H, W
    Hp, Wp = H + 2, W + 2
    Cout_pad = _round_up(Cout, 128)

    # Fold BN scale into weights in f32, pad Cout lane-dense, cast to bf16.
    wf = w_hwio.astype(jnp.float32) * scale.reshape(1, 1, 1, Cout)
    if Cout_pad > Cout:
        wf = jnp.pad(wf, ((0, 0), (0, 0), (0, 0), (0, Cout_pad - Cout)))
    wb = wf.reshape(9, Cin, Cout_pad).astype(jnp.bfloat16)
    sb = jnp.pad(shift.astype(jnp.float32).reshape(1, Cout),
                 ((0, 0), (0, Cout_pad - Cout)))

    # Padded-grid rows: row p = n*Hp*Wp + a*Wp + b  <->  padded position (a, b).
    xp = jnp.pad(x_nhwc.astype(jnp.bfloat16), ((0, 0), (1, 1), (1, 1), (0, 0)))
    M = N * Hp * Wp
    halo = 2 * Wp + 2
    hb = _round_up(halo, 16)

    nblk = max(1, _cdiv(M, 512))
    if M >= 2 * hb:
        nblk = max(nblk, 2)                  # keep both v7x TensorCores busy
    tm = _round_up(_cdiv(M, nblk), hb)       # tm multiple of hb (and of 16)
    gm = _cdiv(M, tm)
    M_pad = gm * tm
    steps = tm // hb                         # halo block index stride

    xf = jnp.pad(xp.reshape(M, Cin), ((0, M_pad + hb - M), (0, 0)))

    in_specs = [
        pl.BlockSpec((tm, Cin), lambda i: (i, 0)),
        pl.BlockSpec((hb, Cin), lambda i: ((i + 1) * steps, 0)),   # halo rows
        pl.BlockSpec((9, Cin, Cout_pad), lambda i: (0, 0, 0)),     # resident
        pl.BlockSpec((1, Cout_pad), lambda i: (0, 0)),
    ]
    args = [xf, xf, wb, sb]

    if residual is not None:
        # Residual lives on the same padded grid (valid block top-left), bf16.
        rp = jnp.pad(residual.astype(jnp.bfloat16),
                     ((0, 0), (0, 2), (0, 2), (0, Cout_pad - Cout)))
        rf = jnp.pad(rp.reshape(M, Cout_pad), ((0, M_pad - M), (0, 0)))
        in_specs.append(pl.BlockSpec((tm, Cout_pad), lambda i: (i, 0)))
        args.append(rf)

    kernel = _make_direct3x3_kernel(Wp, tm, residual is not None, relu)

    out_bytes = jnp.dtype(out_dtype).itemsize
    est = (2 * tm * Cin * 2 + 2 * hb * Cin * 2          # x + halo (dbl buffered)
           + 2 * 9 * Cin * Cout_pad * 2                 # weights
           + 2 * tm * Cout_pad * out_bytes              # output
           + (2 * tm * Cout_pad * 2 if residual is not None else 0)
           + (tm + hb) * Cin * 2 + 3 * tm * Cout_pad * 4)   # in-kernel temps

    out = pl.pallas_call(
        kernel,
        out_shape=jax.ShapeDtypeStruct((M_pad, Cout_pad), out_dtype),
        grid_spec=pltpu.PrefetchScalarGridSpec(
            num_scalar_prefetch=0,
            grid=(gm,),
            in_specs=in_specs,
            out_specs=pl.BlockSpec((tm, Cout_pad), lambda i: (i, 0)),
        ),
        compiler_params=pltpu.CompilerParams(
            dimension_semantics=("parallel",),
            vmem_limit_bytes=_vmem_limit(est),
        ),
    )(*args)

    out = out[:M, :Cout].reshape(N, Hp, Wp, Cout)
    return out[:, :Ho, :Wo, :]


# ---------------------------------------------------------------------------
# Kernel 2: matmul + folded-BN shift (+ ReLU)  (im2col conv / 1x1 projection)
# ---------------------------------------------------------------------------
def _make_matmul_kernel(apply_relu, k_tiled):
    if k_tiled:
        def kernel(x_ref, w_ref, shift_ref, o_ref, acc_ref):
            k = pl.program_id(1)

            @pl.when(k == 0)
            def _():
                acc_ref[...] = jnp.zeros_like(acc_ref)

            acc_ref[...] += jnp.dot(x_ref[...], w_ref[...],
                                    preferred_element_type=jnp.float32)

            @pl.when(k == pl.num_programs(1) - 1)
            def _():
                y = acc_ref[...] + shift_ref[...]
                if apply_relu:
                    y = jnp.maximum(y, 0.0)
                o_ref[...] = y.astype(o_ref.dtype)
    else:
        def kernel(x_ref, w_ref, shift_ref, o_ref):
            y = jnp.dot(x_ref[...], w_ref[...],
                        preferred_element_type=jnp.float32) + shift_ref[...]
            if apply_relu:
                y = jnp.maximum(y, 0.0)
            o_ref[...] = y.astype(o_ref.dtype)
    return kernel


def _pick_tk(K, tk_max=2048):
    """Divisor-aware K tile: multiple of 128, minimal padding, prefer 256-mult."""
    if K <= tk_max:
        return K                              # single full-extent K block
    best_tk, best_key = None, None
    for tk in range(128, tk_max + 1, 128):
        waste = _round_up(K, tk) - K
        key = (waste, 0 if tk % 256 == 0 else 1, -tk)
        if best_key is None or key < best_key:
            best_key, best_tk = key, tk
    return best_tk


def fused_matmul_bn(x2d, w2d, scale, shift, relu=True, out_dtype=jnp.bfloat16):
    """(M, K) @ (K, Cout) with BN scale folded into weights, + shift (+ ReLU)."""
    M, K = x2d.shape
    Cout = w2d.shape[1]
    Cout_pad = _round_up(Cout, 128)

    nblk = max(1, _cdiv(M, 512))
    if M > 256:
        nblk = max(nblk, 2)                   # v7x: feed both TensorCores
    tm = _round_up(_cdiv(M, nblk), 16)
    gm = _cdiv(M, tm)
    M_pad = gm * tm

    tk = _pick_tk(K)
    K_pad = _round_up(K, tk)
    gk = K_pad // tk

    # Fold BN scale into weights (f32), zero-fill any K/Cout padding, cast bf16.
    wf = w2d.astype(jnp.float32) * scale.reshape(1, Cout)
    if Cout_pad > Cout or K_pad > K:
        wf = jnp.pad(wf, ((0, K_pad - K), (0, Cout_pad - Cout)))
    wb = wf.astype(jnp.bfloat16)
    xb = x2d.astype(jnp.bfloat16)
    if M_pad > M or K_pad > K:
        xb = jnp.pad(xb, ((0, M_pad - M), (0, K_pad - K)))
    sb = jnp.pad(shift.astype(jnp.float32).reshape(1, Cout),
                 ((0, 0), (0, Cout_pad - Cout)))

    kernel = _make_matmul_kernel(relu, k_tiled=(gk > 1))
    out_bytes = jnp.dtype(out_dtype).itemsize
    est = (2 * tm * tk * 2 + 2 * tk * Cout_pad * 2
           + 2 * tm * Cout_pad * out_bytes + tm * Cout_pad * 4
           + 4 * Cout_pad * 4)

    if gk == 1:   # common case: no scratch accumulator, no K grid axis
        grid_spec = pltpu.PrefetchScalarGridSpec(
            num_scalar_prefetch=0,
            grid=(gm,),
            in_specs=[pl.BlockSpec((tm, K_pad), lambda i: (i, 0)),
                      pl.BlockSpec((K_pad, Cout_pad), lambda i: (0, 0)),
                      pl.BlockSpec((1, Cout_pad), lambda i: (0, 0))],
            out_specs=pl.BlockSpec((tm, Cout_pad), lambda i: (i, 0)),
        )
        dims = ("parallel",)
    else:
        grid_spec = pltpu.PrefetchScalarGridSpec(
            num_scalar_prefetch=0,
            grid=(gm, gk),                     # reduction (K) axis last
            in_specs=[pl.BlockSpec((tm, tk), lambda i, k: (i, k)),
                      pl.BlockSpec((tk, Cout_pad), lambda i, k: (k, 0)),
                      pl.BlockSpec((1, Cout_pad), lambda i, k: (0, 0))],
            out_specs=pl.BlockSpec((tm, Cout_pad), lambda i, k: (i, 0)),
            scratch_shapes=[pltpu.VMEM((tm, Cout_pad), jnp.float32)],
        )
        dims = ("parallel", "arbitrary")

    out = pl.pallas_call(
        kernel,
        out_shape=jax.ShapeDtypeStruct((M_pad, Cout_pad), out_dtype),
        grid_spec=grid_spec,
        compiler_params=pltpu.CompilerParams(
            dimension_semantics=dims,
            vmem_limit_bytes=_vmem_limit(est),
        ),
    )(xb, wb, sb)
    return out[:M, :Cout]


# ---------------------------------------------------------------------------
# Glue: im2col (stride-2 conv1 only), weight layout, BN folding
# ---------------------------------------------------------------------------
def im2col(x_nhwc, ksize, stride, pad):
    N, H, W, C = x_nhwc.shape
    Ho = (H + 2 * pad - ksize) // stride + 1
    Wo = (W + 2 * pad - ksize) // stride + 1
    xp = jnp.pad(x_nhwc, ((0, 0), (pad, pad), (pad, pad), (0, 0)))
    cols = []
    for kh in range(ksize):
        for kw in range(ksize):
            cols.append(
                xp[:, kh: kh + (Ho - 1) * stride + 1: stride,
                      kw: kw + (Wo - 1) * stride + 1: stride, :])
    patches = jnp.stack(cols, axis=3)  # (N, Ho, Wo, K*K, C), order (kh, kw, c)
    return patches.reshape(N * Ho * Wo, ksize * ksize * C), Ho, Wo


def conv_weight_to_mat(w_oihw):
    """(Cout, Cin, KH, KW) -> (KH*KW*Cin, Cout), matching im2col ordering."""
    return jnp.transpose(w_oihw, (2, 3, 1, 0)).reshape(-1, w_oihw.shape[0])


def fold_bn(gamma, beta, mean, var, eps=1e-5):
    scale = gamma / jnp.sqrt(var + eps)
    shift = beta - mean * scale
    return scale.reshape(1, -1), shift.reshape(1, -1)


# ---------------------------------------------------------------------------
# BasicBlock forward
# ---------------------------------------------------------------------------
def basic_block_nhwc(x_nhwc, params, stride, out_dtype=jnp.bfloat16):
    """BasicBlock forward on NHWC bf16 activations (chainable across blocks)."""
    N, H, W, Cin = x_nhwc.shape
    planes = params["w_conv1"].shape[0]

    s1, b1 = fold_bn(params["bn1_gamma"], params["bn1_beta"],
                     params["bn1_mean"], params["bn1_var"])

    if stride == 1:
        w1_hwio = jnp.transpose(params["w_conv1"], (2, 3, 1, 0))  # (3,3,Cin,Co)
        out1 = conv3x3_s1_bn(x_nhwc, w1_hwio, s1, b1, residual=None,
                             relu=True, out_dtype=jnp.bfloat16)
        Ho, Wo = H, W
    else:
        # TODO(synk): stride-2 3x3 conv still uses materialized bf16 im2col
        # patches; no direct (space-to-depth) kernel for the strided case yet.
        p1, Ho, Wo = im2col(x_nhwc.astype(jnp.bfloat16), 3, stride, 1)
        out1_2d = fused_matmul_bn(p1, conv_weight_to_mat(params["w_conv1"]),
                                  s1, b1, relu=True, out_dtype=jnp.bfloat16)
        out1 = out1_2d.reshape(N, Ho, Wo, planes)

    # shortcut branch (bf16 residual, fused into the conv2 epilogue)
    if stride != 1 or Cin != planes:
        ssc, bsc = fold_bn(params["bn_sc_gamma"], params["bn_sc_beta"],
                           params["bn_sc_mean"], params["bn_sc_var"])
        xs = x_nhwc[:, ::stride, ::stride, :].reshape(N * Ho * Wo, Cin)
        w_sc = params["w_sc"].reshape(planes, Cin).T          # (Cin, planes)
        shortcut = fused_matmul_bn(xs, w_sc, ssc, bsc, relu=False,
                                   out_dtype=jnp.bfloat16
                                   ).reshape(N, Ho, Wo, planes)
    else:
        shortcut = x_nhwc.astype(jnp.bfloat16)

    # conv2 (3x3, stride 1) + bn2 + shortcut add + ReLU, fully fused, no im2col
    s2, b2 = fold_bn(params["bn2_gamma"], params["bn2_beta"],
                     params["bn2_mean"], params["bn2_var"])
    w2_hwio = jnp.transpose(params["w_conv2"], (2, 3, 1, 0))
    return conv3x3_s1_bn(out1, w2_hwio, s2, b2, residual=shortcut,
                         relu=True, out_dtype=out_dtype)


def basic_block_forward(x_nchw, params, stride):
    """PyTorch-convention wrapper: NCHW f32 in, NCHW f32 out."""
    x_nhwc = jnp.transpose(x_nchw, (0, 2, 3, 1)).astype(jnp.bfloat16)
    out = basic_block_nhwc(x_nhwc, params, stride, out_dtype=jnp.float32)
    return jnp.transpose(out, (0, 3, 1, 2))


# ---------------------------------------------------------------------------
# Pure-JAX f32 reference (correctness check)
# ---------------------------------------------------------------------------
def _conv_ref(x, w, stride, pad):
    return jax.lax.conv_general_dilated(
        x, w, (stride, stride), ((pad, pad), (pad, pad)),
        dimension_numbers=("NCHW", "OIHW", "NCHW"))


def _bn_ref(x, gamma, beta, mean, var, eps=1e-5):
    sh = (1, -1, 1, 1)
    return (x - mean.reshape(sh)) / jnp.sqrt(var.reshape(sh) + eps) * \
        gamma.reshape(sh) + beta.reshape(sh)


def basic_block_ref(x, p, stride):
    out = jax.nn.relu(_bn_ref(_conv_ref(x, p["w_conv1"], stride, 1),
                              p["bn1_gamma"], p["bn1_beta"],
                              p["bn1_mean"], p["bn1_var"]))
    out = _bn_ref(_conv_ref(out, p["w_conv2"], 1, 1),
                  p["bn2_gamma"], p["bn2_beta"], p["bn2_mean"], p["bn2_var"])
    if stride != 1 or x.shape[1] != p["w_conv1"].shape[0]:
        sc = _bn_ref(_conv_ref(x, p["w_sc"], stride, 0),
                     p["bn_sc_gamma"], p["bn_sc_beta"],
                     p["bn_sc_mean"], p["bn_sc_var"])
    else:
        sc = x
    return jax.nn.relu(out + sc)


# ---------------------------------------------------------------------------
def init_params(key, in_planes, planes):
    ks = jax.random.split(key, 8)
    f32 = jnp.float32
    return {
        "w_conv1": 0.1 * jax.random.normal(ks[0], (planes, in_planes, 3, 3), f32),
        "bn1_gamma": 1.0 + 0.1 * jax.random.normal(ks[1], (planes,), f32),
        "bn1_beta": 0.1 * jax.random.normal(ks[2], (planes,), f32),
        "bn1_mean": jnp.zeros((planes,), f32),
        "bn1_var": jnp.ones((planes,), f32),
        "w_conv2": 0.1 * jax.random.normal(ks[3], (planes, planes, 3, 3), f32),
        "bn2_gamma": 1.0 + 0.1 * jax.random.normal(ks[4], (planes,), f32),
        "bn2_beta": 0.1 * jax.random.normal(ks[5], (planes,), f32),
        "bn2_mean": jnp.zeros((planes,), f32),
        "bn2_var": jnp.ones((planes,), f32),
        "w_sc": 0.1 * jax.random.normal(ks[6], (planes, in_planes, 1, 1), f32),
        "bn_sc_gamma": 1.0 + 0.1 * jax.random.normal(ks[7], (planes,), f32),
        "bn_sc_beta": jnp.zeros((planes,), f32),
        "bn_sc_mean": jnp.zeros((planes,), f32),
        "bn_sc_var": jnp.ones((planes,), f32),
    }


if __name__ == "__main__":
    key = jax.random.PRNGKey(0)
    k1, k2, k3, k4 = jax.random.split(key, 4)

    # Downsample block: stride 2, 4 -> 8 channels.
    # Exercises: im2col conv1, 1x1 projection shortcut, direct conv2 with
    # fused bf16 residual + ReLU.
    x_a = jax.random.normal(k1, (2, 4, 16, 16), jnp.float32)       # NCHW
    p_a = init_params(k2, 4, 8)
    fwd_a = jax.jit(functools.partial(basic_block_forward, stride=2))
    out_a = jax.block_until_ready(fwd_a(x_a, p_a))
    ref_a = basic_block_ref(x_a, p_a, 2)
    np.testing.assert_allclose(np.asarray(out_a, np.float32), np.asarray(ref_a),
                               rtol=6e-2, atol=6e-2)

    # Identity block: stride 1, 8 -> 8 channels.
    # Exercises: direct (no-im2col) 3x3 kernel for both convs, fused identity
    # residual + ReLU.
    x_b = jax.random.normal(k3, (2, 8, 16, 16), jnp.float32)       # NCHW
    p_b = init_params(k4, 8, 8)
    fwd_b = jax.jit(functools.partial(basic_block_forward, stride=1))
    out_b = jax.block_until_ready(fwd_b(x_b, p_b))
    ref_b = basic_block_ref(x_b, p_b, 1)
    np.testing.assert_allclose(np.asarray(out_b, np.float32), np.asarray(ref_b),
                               rtol=6e-2, atol=6e-2)

    print("KERNEL_OK")
</pallas_src>

<mosaic_0001>
module attributes {stable_mosaic.version = 11 : i64} {
  func.func @kernel(%arg0: i32, %arg1: memref<128x36xbf16, #tpu.memory_space<vmem>>, %arg2: memref<36x128xbf16, #tpu.memory_space<vmem>>, %arg3: memref<1x128xf32, #tpu.memory_space<vmem>>, %arg4: memref<128x128xbf16, #tpu.memory_space<vmem>>) attributes {dimension_semantics = [#tpu.dimension_semantics<parallel>], iteration_bounds = array<i64: 1>, scalar_prefetch = 0 : i64, scratch_operands = 0 : i64, tpu.core_type = #tpu.core_type<tc>, window_params = [{transform_indices = @transform_0, window_bounds = array<i64: 128, 36>}, {pipeline_mode = #tpu.pipeline_mode<synchronous>, transform_indices = @transform_1, window_bounds = array<i64: 36, 128>}, {pipeline_mode = #tpu.pipeline_mode<synchronous>, transform_indices = @transform_2, window_bounds = array<i64: 1, 128>}, {transform_indices = @transform_3, window_bounds = array<i64: 128, 128>}]} {
    %c0 = arith.constant 0 : index
    %c0_0 = arith.constant 0 : index
    %0 = vector.load %arg1[%c0, %c0_0] : memref<128x36xbf16, #tpu.memory_space<vmem>>, vector<128x36xbf16>
    %c0_1 = arith.constant 0 : index
    %c0_2 = arith.constant 0 : index
    %1 = vector.load %arg2[%c0_1, %c0_2] : memref<36x128xbf16, #tpu.memory_space<vmem>>, vector<36x128xbf16>
    %cst = arith.constant dense<0.000000e+00> : vector<128x128xf32>
    %2 = tpu.matmul %0, %1, %cst {dimension_numbers = #tpu.dot_dimension_numbers<[1], [0], [0], [1], [0, 0, 1, 1], [], []>} : vector<128x36xbf16>, vector<36x128xbf16>, vector<128x128xf32> -> vector<128x128xf32>
    %c0_3 = arith.constant 0 : index
    %c0_4 = arith.constant 0 : index
    %3 = vector.load %arg3[%c0_3, %c0_4] : memref<1x128xf32, #tpu.memory_space<vmem>>, vector<1x128xf32>
    %4 = vector.broadcast %3 : vector<1x128xf32> to vector<128x128xf32>
    %5 = arith.addf %2, %4 : vector<128x128xf32>
    %cst_5 = arith.constant 0.000000e+00 : f32
    %6 = vector.broadcast %cst_5 : f32 to vector<128x128xf32>
    %7 = arith.maximumf %5, %6 : vector<128x128xf32>
    %8 = arith.truncf %7 : vector<128x128xf32> to vector<128x128xbf16>
    %c0_6 = arith.constant 0 : index
    %c0_7 = arith.constant 0 : index
    %9 = vector.load %arg4[%c0_6, %c0_7] : memref<128x128xbf16, #tpu.memory_space<vmem>>, vector<128x128xbf16>
    tpu.vector_store %arg4[%c0_6, %c0_7], %8 {strides = array<i32>} : memref<128x128xbf16, #tpu.memory_space<vmem>>, vector<128x128xbf16>,
    return
  }
  func.func @transform_0(%arg0: i32) -> (i32, i32) {
    %c0_i32 = arith.constant 0 : i32
    %c0_i32_0 = arith.constant 0 : i32
    return %arg0, %c0_i32 : i32, i32
  }
  func.func @transform_1(%arg0: i32) -> (i32, i32) {
    %c0_i32 = arith.constant 0 : i32
    %c0_i32_0 = arith.constant 0 : i32
    %c0_i32_1 = arith.constant 0 : i32
    return %c0_i32, %c0_i32_0 : i32, i32
  }
  func.func @transform_2(%arg0: i32) -> (i32, i32) {
    %c0_i32 = arith.constant 0 : i32
    %c0_i32_0 = arith.constant 0 : i32
    %c0_i32_1 = arith.constant 0 : i32
    return %c0_i32, %c0_i32_0 : i32, i32
  }
  func.func @transform_3(%arg0: i32) -> (i32, i32) {
    %c0_i32 = arith.constant 0 : i32
    %c0_i32_0 = arith.constant 0 : i32
    return %arg0, %c0_i32 : i32, i32
  }
}

module attributes {stable_mosaic.version = 11 : i64} {
  func.func @kernel(%arg0: i32, %arg1: memref<128x4xbf16, #tpu.memory_space<vmem>>, %arg2: memref<4x128xbf16, #tpu.memory_space<vmem>>, %arg3: memref<1x128xf32, #tpu.memory_space<vmem>>, %arg4: memref<128x128xbf16, #tpu.memory_space<vmem>>) attributes {dimension_semantics = [#tpu.dimension_semantics<parallel>], iteration_bounds = array<i64: 1>, scalar_prefetch = 0 : i64, scratch_operands = 0 : i64, tpu.core_type = #tpu.core_type<tc>, window_params = [{transform_indices = @transform_0, window_bounds = array<i64: 128, 4>}, {pipeline_mode = #tpu.pipeline_mode<synchronous>, transform_indices = @transform_1, window_bounds = array<i64: 4, 128>}, {pipeline_mode = #tpu.pipeline_mode<synchronous>, transform_indices = @transform_2, window_bounds = array<i64: 1, 128>}, {transform_indices = @transform_3, window_bounds = array<i64: 128, 128>}]} {
    %c0 = arith.constant 0 : index
    %c0_0 = arith.constant 0 : index
    %0 = vector.load %arg1[%c0, %c0_0] : memref<128x4xbf16, #tpu.memory_space<vmem>>, vector<128x4xbf16>
    %c0_1 = arith.constant 0 : index
    %c0_2 = arith.constant 0 : index
    %1 = vector.load %arg2[%c0_1, %c0_2] : memref<4x128xbf16, #tpu.memory_space<vmem>>, vector<4x128xbf16>
    %cst = arith.constant dense<0.000000e+00> : vector<128x128xf32>
    %2 = tpu.matmul %0, %1, %cst {dimension_numbers = #tpu.dot_dimension_numbers<[1], [0], [0], [1], [0, 0, 1, 1], [], []>} : vector<128x4xbf16>, vector<4x128xbf16>, vector<128x128xf32> -> vector<128x128xf32>
    %c0_3 = arith.constant 0 : index
    %c0_4 = arith.constant 0 : index
    %3 = vector.load %arg3[%c0_3, %c0_4] : memref<1x128xf32, #tpu.memory_space<vmem>>, vector<1x128xf32>
    %4 = vector.broadcast %3 : vector<1x128xf32> to vector<128x128xf32>
    %5 = arith.addf %2, %4 : vector<128x128xf32>
    %6 = arith.truncf %5 : vector<128x128xf32> to vector<128x128xbf16>
    %c0_5 = arith.constant 0 : index
    %c0_6 = arith.constant 0 : index
    %7 = vector.load %arg4[%c0_5, %c0_6] : memref<128x128xbf16, #tpu.memory_space<vmem>>, vector<128x128xbf16>
    tpu.vector_store %arg4[%c0_5, %c0_6], %6 {strides = array<i32>} : memref<128x128xbf16, #tpu.memory_space<vmem>>, vector<128x128xbf16>,
    return
  }
  func.func @transform_0(%arg0: i32) -> (i32, i32) {
    %c0_i32 = arith.constant 0 : i32
    %c0_i32_0 = arith.constant 0 : i32
    return %arg0, %c0_i32 : i32, i32
  }
  func.func @transform_1(%arg0: i32) -> (i32, i32) {
    %c0_i32 = arith.constant 0 : i32
    %c0_i32_0 = arith.constant 0 : i32
    %c0_i32_1 = arith.constant 0 : i32
    return %c0_i32, %c0_i32_0 : i32, i32
  }
  func.func @transform_2(%arg0: i32) -> (i32, i32) {
    %c0_i32 = arith.constant 0 : i32
    %c0_i32_0 = arith.constant 0 : i32
    %c0_i32_1 = arith.constant 0 : i32
    return %c0_i32, %c0_i32_0 : i32, i32
  }
  func.func @transform_3(%arg0: i32) -> (i32, i32) {
    %c0_i32 = arith.constant 0 : i32
    %c0_i32_0 = arith.constant 0 : i32
    return %arg0, %c0_i32 : i32, i32
  }
}

module attributes {stable_mosaic.version = 11 : i64} {
  func.func @kernel(%arg0: i32, %arg1: memref<128x8xbf16, #tpu.memory_space<vmem>>, %arg2: memref<32x8xbf16, #tpu.memory_space<vmem>>, %arg3: memref<9x8x128xbf16, #tpu.memory_space<vmem>>, %arg4: memref<1x128xf32, #tpu.memory_space<vmem>>, %arg5: memref<128x128xbf16, #tpu.memory_space<vmem>>, %arg6: memref<128x128xf32, #tpu.memory_space<vmem>>) attributes {dimension_semantics = [#tpu.dimension_semantics<parallel>], iteration_bounds = array<i64: 2>, scalar_prefetch = 0 : i64, scratch_operands = 0 : i64, tpu.core_type = #tpu.core_type<tc>, window_params = [{transform_indices = @transform_0, window_bounds = array<i64: 128, 8>}, {transform_indices = @transform_1, window_bounds = array<i64: 32, 8>}, {pipeline_mode = #tpu.pipeline_mode<synchronous>, transform_indices = @transform_2, window_bounds = array<i64: 9, 8, 128>}, {pipeline_mode = #tpu.pipeline_mode<synchronous>, transform_indices = @transform_3, window_bounds = array<i64: 1, 128>}, {transform_indices = @transform_4, window_bounds = array<i64: 128, 128>}, {transform_indices = @transform_5, window_bounds = array<i64: 128, 128>}]} {
    %c0 = arith.constant 0 : index
    %c0_0 = arith.constant 0 : index
    %0 = vector.load %arg1[%c0, %c0_0] : memref<128x8xbf16, #tpu.memory_space<vmem>>, vector<128x8xbf16>
    %c0_1 = arith.constant 0 : index
    %c0_2 = arith.constant 0 : index
    %1 = vector.load %arg2[%c0_1, %c0_2] : memref<32x8xbf16, #tpu.memory_space<vmem>>, vector<32x8xbf16>
    %2 = tpu.concatenate %0, %1 in 0 : vector<128x8xbf16>, vector<32x8xbf16> -> vector<160x8xbf16>
    %3 = vector.extract_strided_slice %2 {offsets = [0, 0], sizes = [128, 8], strides = [1, 1]} : vector<160x8xbf16> to vector<128x8xbf16>
    %c0_3 = arith.constant 0 : index
    %c0_4 = arith.constant 0 : index
    %c0_5 = arith.constant 0 : index
    %4 = vector.load %arg3[%c0_3, %c0_4, %c0_5] : memref<9x8x128xbf16, #tpu.memory_space<vmem>>, vector<1x8x128xbf16>
    %5 = vector.shape_cast %4 : vector<1x8x128xbf16> to vector<8x128xbf16>
    %cst = arith.constant dense<0.000000e+00> : vector<128x128xf32>
    %6 = tpu.matmul %3, %5, %cst {dimension_numbers = #tpu.dot_dimension_numbers<[1], [0], [0], [1], [0, 0, 1, 1], [], []>} : vector<128x8xbf16>, vector<8x128xbf16>, vector<128x128xf32> -> vector<128x128xf32>
    %7 = vector.extract_strided_slice %2 {offsets = [1, 0], sizes = [128, 8], strides = [1, 1]} : vector<160x8xbf16> to vector<128x8xbf16>
    %c1 = arith.constant 1 : index
    %c0_6 = arith.constant 0 : index
    %c0_7 = arith.constant 0 : index
    %8 = vector.load %arg3[%c1, %c0_6, %c0_7] : memref<9x8x128xbf16, #tpu.memory_space<vmem>>, vector<1x8x128xbf16>
    %9 = vector.shape_cast %8 : vector<1x8x128xbf16> to vector<8x128xbf16>
    %cst_8 = arith.constant dense<0.000000e+00> : vector<128x128xf32>
    %10 = tpu.matmul %7, %9, %cst_8 {dimension_numbers = #tpu.dot_dimension_numbers<[1], [0], [0], [1], [0, 0, 1, 1], [], []>} : vector<128x8xbf16>, vector<8x128xbf16>, vector<128x128xf32> -> vector<128x128xf32>
    %11 = arith.addf %6, %10 : vector<128x128xf32>
    %12 = vector.extract_strided_slice %2 {offsets = [2, 0], sizes = [128, 8], strides = [1, 1]} : vector<160x8xbf16> to vector<128x8xbf16>
    %c2 = arith.constant 2 : index
    %c0_9 = arith.constant 0 : index
    %c0_10 = arith.constant 0 : index
    %13 = vector.load %arg3[%c2, %c0_9, %c0_10] : memref<9x8x128xbf16, #tpu.memory_space<vmem>>, vector<1x8x128xbf16>
    %14 = vector.shape_cast %13 : vector<1x8x128xbf16> to vector<8x128xbf16>
    %cst_11 = arith.constant dense<0.000000e+00> : vector<128x128xf32>
    %15 = tpu.matmul %12, %14, %cst_11 {dimension_numbers = #tpu.dot_dimension_numbers<[1], [0], [0], [1], [0, 0, 1, 1], [], []>} : vector<128x8xbf16>, vector<8x128xbf16>, vector<128x128xf32> -> vector<128x128xf32>
    %16 = arith.addf %11, %15 : vector<128x128xf32>
    %17 = vector.extract_strided_slice %2 {offsets = [10, 0], sizes = [128, 8], strides = [1, 1]} : vector<160x8xbf16> to vector<128x8xbf16>
    %c3 = arith.constant 3 : index
    %c0_12 = arith.constant 0 : index
    %c0_13 = arith.constant 0 : index
    %18 = vector.load %arg3[%c3, %c0_12, %c0_13] : memref<9x8x128xbf16, #tpu.memory_space<vmem>>, vector<1x8x128xbf16>
    %19 = vector.shape_cast %18 : vector<1x8x128xbf16> to vector<8x128xbf16>
    %cst_14 = arith.constant dense<0.000000e+00> : vector<128x128xf32>
    %20 = tpu.matmul %17, %19, %cst_14 {dimension_numbers = #tpu.dot_dimension_numbers<[1], [0], [0], [1], [0, 0, 1, 1], [], []>} : vector<128x8xbf16>, vector<8x128xbf16>, vector<128x128xf32> -> vector<128x128xf32>
    %21 = arith.addf %16, %20 : vector<128x128xf32>
    %22 = vector.extract_strided_slice %2 {offsets = [11, 0], sizes = [128, 8], strides = [1, 1]} : vector<160x8xbf16> to vector<128x8xbf16>
    %c4 = arith.constant 4 : index
    %c0_15 = arith.constant 0 : index
    %c0_16 = arith.constant 0 : index
    %23 = vector.load %arg3[%c4, %c0_15, %c0_16] : memref<9x8x128xbf16, #tpu.memory_space<vmem>>, vector<1x8x128xbf16>
    %24 = vector.shape_cast %23 : vector<1x8x128xbf16> to vector<8x128xbf16>
    %cst_17 = arith.constant dense<0.000000e+00> : vector<128x128xf32>
    %25 = tpu.matmul %22, %24, %cst_17 {dimension_numbers = #tpu.dot_dimension_numbers<[1], [0], [0], [1], [0, 0, 1, 1], [], []>} : vector<128x8xbf16>, vector<8x128xbf16>, vector<128x128xf32> -> vector<128x128xf32>
    %26 = arith.addf %21, %25 : vector<128x128xf32>
    %27 = vector.extract_strided_slice %2 {offsets = [12, 0], sizes = [128, 8], strides = [1, 1]} : vector<160x8xbf16> to vector<128x8xbf16>
    %c5 = arith.constant 5 : index
    %c0_18 = arith.constant 0 : index
    %c0_19 = arith.constant 0 : index
    %28 = vector.load %arg3[%c5, %c0_18, %c0_19] : memref<9x8x128xbf16, #tpu.memory_space<vmem>>, vector<1x8x128xbf16>
    %29 = vector.shape_cast %28 : vector<1x8x128xbf16> to vector<8x128xbf16>
    %cst_20 = arith.constant dense<0.000000e+00> : vector<128x128xf32>
    %30 = tpu.matmul %27, %29, %cst_20 {dimension_numbers = #tpu.dot_dimension_numbers<[1], [0], [0], [1], [0, 0, 1, 1], [], []>} : vector<128x8xbf16>, vector<8x128xbf16>, vector<128x128xf32> -> vector<128x128xf32>
    %31 = arith.addf %26, %30 : vector<128x128xf32>
    %32 = vector.extract_strided_slice %2 {offsets = [20, 0], sizes = [128, 8], strides = [1, 1]} : vector<160x8xbf16> to vector<128x8xbf16>
    %c6 = arith.constant 6 : index
    %c0_21 = arith.constant 0 : index
    %c0_22 = arith.constant 0 : index
    %33 = vector.load %arg3[%c6, %c0_21, %c0_22] : memref<9x8x128xbf16, #tpu.memory_space<vmem>>, vector<1x8x128xbf16>
    %34 = vector.shape_cast %33 : vector<1x8x128xbf16> to vector<8x128xbf16>
    %cst_23 = arith.constant dense<0.000000e+00> : vector<128x128xf32>
    %35 = tpu.matmul %32, %34, %cst_23 {dimension_numbers = #tpu.dot_dimension_numbers<[1], [0], [0], [1], [0, 0, 1, 1], [], []>} : vector<128x8xbf16>, vector<8x128xbf16>, vector<128x128xf32> -> vector<128x128xf32>
    %36 = arith.addf %31, %35 : vector<128x128xf32>
    %37 = vector.extract_strided_slice %2 {offsets = [21, 0], sizes = [128, 8], strides = [1, 1]} : vector<160x8xbf16> to vector<128x8xbf16>
    %c7 = arith.constant 7 : index
    %c0_24 = arith.constant 0 : index
    %c0_25 = arith.constant 0 : index
    %38 = vector.load %arg3[%c7, %c0_24, %c0_25] : memref<9x8x128xbf16, #tpu.memory_space<vmem>>, vector<1x8x128xbf16>
    %39 = vector.shape_cast %38 : vector<1x8x128xbf16> to vector<8x128xbf16>
    %cst_26 = arith.constant dense<0.000000e+00> : vector<128x128xf32>
    %40 = tpu.matmul %37, %39, %cst_26 {dimension_numbers = #tpu.dot_dimension_numbers<[1], [0], [0], [1], [0, 0, 1, 1], [], []>} : vector<128x8xbf16>, vector<8x128xbf16>, vector<128x128xf32> -> vector<128x128xf32>
    %41 = arith.addf %36, %40 : vector<128x128xf32>
    %42 = vector.extract_strided_slice %2 {offsets = [22, 0], sizes = [128, 8], strides = [1, 1]} : vector<160x8xbf16> to vector<128x8xbf16>
    %c8 = arith.constant 8 : index
    %c0_27 = arith.constant 0 : index
    %c0_28 = arith.constant 0 : index
    %43 = vector.load %arg3[%c8, %c0_27, %c0_28] : memref<9x8x128xbf16, #tpu.memory_space<vmem>>, vector<1x8x128xbf16>
    %44 = vector.shape_cast %43 : vector<1x8x128xbf16> to vector<8x128xbf16>
    %cst_29 = arith.constant dense<0.000000e+00> : vector<128x128xf32>
    %45 = tpu.matmul %42, %44, %cst_29 {dimension_numbers = #tpu.dot_dimension_numbers<[1], [0], [0], [1], [0, 0, 1, 1], [], []>} : vector<128x8xbf16>, vector<8x128xbf16>, vector<128x128xf32> -> vector<128x128xf32>
    %46 = arith.addf %41, %45 : vector<128x128xf32>
    %c0_30 = arith.constant 0 : index
    %c0_31 = arith.constant 0 : index
    %47 = vector.load %arg4[%c0_30, %c0_31] : memref<1x128xf32, #tpu.memory_space<vmem>>, vector<1x128xf32>
    %48 = vector.broadcast %47 : vector<1x128xf32> to vector<128x128xf32>
    %49 = arith.addf %46, %48 : vector<128x128xf32>
    %c0_32 = arith.constant 0 : index
    %c0_33 = arith.constant 0 : index
    %50 = vector.load %arg5[%c0_32, %c0_33] : memref<128x128xbf16, #tpu.memory_space<vmem>>, vector<128x128xbf16>
    %51 = arith.extf %50 : vector<128x128xbf16> to vector<128x128xf32>
    %52 = arith.addf %49, %51 : vector<128x128xf32>
    %cst_34 = arith.constant 0.000000e+00 : f32
    %53 = vector.broadcast %cst_34 : f32 to vector<128x128xf32>
    %54 = arith.maximumf %52, %53 : vector<128x128xf32>
    %c0_35 = arith.constant 0 : index
    %c0_36 = arith.constant 0 : index
    %55 = vector.load %arg6[%c0_35, %c0_36] : memref<128x128xf32, #tpu.memory_space<vmem>>, vector<128x128xf32>
    tpu.vector_store %arg6[%c0_35, %c0_36], %54 {strides = array<i32>} : memref<128x128xf32, #tpu.memory_space<vmem>>, vector<128x128xf32>,
    return
  }
  func.func @transform_0(%arg0: i32) -> (i32, i32) {
    %c0_i32 = arith.constant 0 : i32
    %c0_i32_0 = arith.constant 0 : i32
    return %arg0, %c0_i32 : i32, i32
  }
  func.func @transform_1(%arg0: i32) -> (i32, i32) {
    %c1_i32 = arith.constant 1 : i32
    %0 = arith.addi %arg0, %c1_i32 : i32
    %c4_i32 = arith.constant 4 : i32
    %1 = arith.muli %0, %c4_i32 : i32
    %c0_i32 = arith.constant 0 : i32
    %c0_i32_0 = arith.constant 0 : i32
    return %1, %c0_i32 : i32, i32
  }
  func.func @transform_2(%arg0: i32) -> (i32, i32, i32) {
    %c0_i32 = arith.constant 0 : i32
    %c0_i32_0 = arith.constant 0 : i32
    %c0_i32_1 = arith.constant 0 : i32
    %c0_i32_2 = arith.constant 0 : i32
    return %c0_i32, %c0_i32_0, %c0_i32_1 : i32, i32, i32
  }
  func.func @transform_3(%arg0: i32) -> (i32, i32) {
    %c0_i32 = arith.constant 0 : i32
    %c0_i32_0 = arith.constant 0 : i32
    %c0_i32_1 = arith.constant 0 : i32
    return %c0_i32, %c0_i32_0 : i32, i32
  }
  func.func @transform_4(%arg0: i32) -> (i32, i32) {
    %c0_i32 = arith.constant 0 : i32
    %c0_i32_0 = arith.constant 0 : i32
    return %arg0, %c0_i32 : i32, i32
  }
  func.func @transform_5(%arg0: i32) -> (i32, i32) {
    %c0_i32 = arith.constant 0 : i32
    %c0_i32_0 = arith.constant 0 : i32
    return %arg0, %c0_i32 : i32, i32
  }
}

</mosaic_0001>

<bundles_post_ra>
// kernel: basic_block_forward.3
= control target key start
LH: loop header
LB: loop body
LE: loop exit
PB: predicated region body
PF: predicated region fallthrough
CT: control target
= control target key end

     0   :  { %vm98_vm0 = vcmask 293888   ;;  %vm123_vm1 = vcmask 1041408   ;;  %s563_s1 = inlined_call_operand.vmem [shape: bf16[36,128], index: 1, kind: input, shape index: {}]   ;;  %s564_s0 = inlined_call_operand.vmem [shape: bf16[128,36], index: 0, kind: input, shape index: {}]   ;;  %s565_s2 = inlined_call_operand.vmem [shape: f32[1,128], index: 2, kind: input, shape index: {}]   ;;  %s566_s3 = inlined_call_operand.vmem [shape: bf16[128,128], index: 3, kind: output, shape index: {}]  }
   0x1   :  { %v464_v0 = vld [vmem:[%s563_s1] sm:$0xff]   ;;  %v465_v1 = vld [vmem:[%s563_s1 + $0x8] sm:$0xff]   ;;  %v466_v2 = vld [vmem:[%s563_s1 + $0x10] ss:$0 sps:$4 sm:$0x33]  }
   0x2   :  { %434 = vmatprep.subr.bf16.mxu0 %v464_v0  ;;  %456 = vmatprep.subr.bf16.mxu1 %v464_v0  ;;  %v467_v3 = vld [vmem:[%s564_s0] sm:$0xff]   ;;  %v125_v5 = vsel %vm123_vm1, %v466_v2, 0  ;;  %v469_v6 = vld [vmem:[%s564_s0 + $0x8] sm:$0xff]   ;;  %v471_v8 = vld [vmem:[%s564_s0 + $0x10] sm:$0xff]  }
   0x3   :  { %435 = vmatpush3.bf16.msra.mxu0 %v464_v0  ;;  %459 = vmatpush3.bf16.msra.mxu1 %v464_v0  ;;  %v468_v4 = vld [vmem:[%s564_s0 + $0x20] sm:$0xff]   ;;  %v470_v7 = vld [vmem:[%s564_s0 + $0x28] sm:$0xff]   ;;  %v472_v9 = vld [vmem:[%s564_s0 + $0x30] sm:$0xff]  }
   0x4   :  { %436 = vmatprep.subr.bf16.mxu0 %v465_v1  ;;  %457 = vmatprep.subr.bf16.mxu1 %v465_v1  ;;  %v473_v10 = vld [vmem:[%s564_s0 + $0x18] sm:$0xff]   ;;  %v324_v12 = vld [vmem:[%s565_s2] ss:$0 sm:$0xff] }
   0x5   :  { %440 = vmatprep.mubr.msk.bf16.mxu0 %vm98_vm0, %v467_v3  ;;  %448 = vmatprep.mubr.msk.bf16.mxu1 %vm98_vm0, %v468_v4  ;;  %v474_v11 = vld [vmem:[%s564_s0 + $0x38] sm:$0xff]  }
   0x7   :  { %437 = vmatpush3.bf16.msra.mxu0 %v465_v1  ;;  %460 = vmatpush3.bf16.msra.mxu1 %v465_v1 }
   0x8   :  { %462 = vmatprep.subr.msk.bf16.mxu0 %vm123_vm1, %v466_v2  ;;  %463 = vmatprep.subr.msk.bf16.mxu1 %vm123_vm1, %v466_v2 }
   0xb   :  { %439 = vmatpush3.bf16.msra.mxu0 %v125_v5  ;;  %461 = vmatpush3.bf16.msra.mxu1 %v125_v5 }
   0xe   :  { %441 = vmatmul.mubr.msk.bf16.vlgmr.msra.gmra.mrb[0].mxu0 %vm98_vm0, %v469_v6  ;;  %449 = vmatmul.mubr.msk.bf16.vlgmr.msra.gmra.mrb[0].mxu1 %vm98_vm0, %v470_v7 }
   0xf   :  { %444 = vmatprep.mubr.msk.bf16.mxu0 %vm98_vm0, %v471_v8  ;;  %452 = vmatprep.mubr.msk.bf16.mxu1 %vm98_vm0, %v472_v9 }
  0x16   :  { %445 = vmatmul.mubr.msk.bf16.gmra.mrb[4].mxu0 %vm98_vm0, %v473_v10  ;;  %453 = vmatmul.mubr.msk.bf16.gmra.mrb[4].mxu1 %vm98_vm0, %v474_v11 }
  0xe1   :  { %v442_v13 = vpop.f32.mrb[0].mxu0  ;;  %v450_v14 = vpop.f32.mrb[0].mxu1 }
  0xe2   :  { %v170_v15 = vadd.f32 %v442_v13, %v324_v12  ;;  %v202_v16 = vadd.f32 %v450_v14, %v324_v12  ;;  %v161_v17 = vpop.f32.mrb[1].mxu0  ;;  %v193_v18 = vpop.f32.mrb[1].mxu1 }
  0xe3   :  { %v162_v19 = vadd.f32 %v324_v12, %v161_v17  ;;  %v194_v20 = vadd.f32 %v324_v12, %v193_v18  ;;  %v443_v21 = vpop.f32.mrb[2].mxu0  ;;  %v451_v22 = vpop.f32.mrb[2].mxu1 }
  0xe4   :  { %v173_v23 = vadd.f32 %v443_v21, %v324_v12  ;;  %v205_v24 = vadd.f32 %v451_v22, %v324_v12  ;;  %v164_v25 = vpop.f32.mrb[3].mxu0  ;;  %v196_v26 = vpop.f32.mrb[3].mxu1  ;;  %v226_v29 = vmax.f32 %v170_v15, 0.0  ;;  %v234_v30 = vmax.f32 %v202_v16, 0.0 }
  0xe5   :  { %v165_v27 = vadd.f32 %v324_v12, %v164_v25  ;;  %v197_v28 = vadd.f32 %v324_v12, %v196_v26  ;;  %v224_v33 = vmax.f32 %v162_v19, 0.0  ;;  %v232_v34 = vmax.f32 %v194_v20, 0.0 }
  0xe6   :  { %v227_v31 = vmax.f32 %v173_v23, 0.0  ;;  %v235_v32 = vmax.f32 %v205_v24, 0.0 }
  0xe7   :  { %v225_v35 = vmax.f32 %v165_v27, 0.0  ;;  %v233_v36 = vmax.f32 %v197_v28, 0.0 }
  0xe8   :  { %v384_v37 = vpack.c.bf16 %v227_v31, %v226_v29  ;;  %v404_v38 = vpack.c.bf16 %v235_v32, %v234_v30 }
  0xe9   :  { %v379_v39 = vpack.c.bf16 %v225_v35, %v224_v33  ;;  %v399_v40 = vpack.c.bf16 %v233_v36, %v232_v34  ;;  %v446_v41 = vpop.f32.mrb[4].mxu0  ;;  %v454_v42 = vpop.f32.mrb[4].mxu1 }
  0xea   :  { %416 = vst [vmem:[%s566_s3 + $0x8] sm:$0xff] %v384_v37   ;;  %420 = vst [vmem:[%s566_s3 + $0x28] sm:$0xff] %v404_v38   ;;  %v186_v43 = vadd.f32 %v446_v41, %v324_v12  ;;  %v218_v44 = vadd.f32 %v454_v42, %v324_v12  ;;  %v177_v45 = vpop.f32.mrb[5].mxu0  ;;  %v209_v46 = vpop.f32.mrb[5].mxu1 }
  0xeb   :  { %380 = vst [vmem:[%s566_s3] sm:$0xff] %v379_v39   ;;  %419 = vst [vmem:[%s566_s3 + $0x20] sm:$0xff] %v399_v40   ;;  %v178_v47 = vadd.f32 %v324_v12, %v177_v45  ;;  %v210_v48 = vadd.f32 %v324_v12, %v209_v46  ;;  %v447_v49 = vpop.f32.mrb[6].mxu0  ;;  %v455_v50 = vpop.f32.mrb[6].mxu1 }
  0xec   :  { %v189_v51 = vadd.f32 %v447_v49, %v324_v12  ;;  %v221_v52 = vadd.f32 %v455_v50, %v324_v12  ;;  %v180_v53 = vpop.f32.mrb[7].mxu0  ;;  %v212_v54 = vpop.f32.mrb[7].mxu1  ;;  %v230_v57 = vmax.f32 %v186_v43, 0.0  ;;  %v238_v58 = vmax.f32 %v218_v44, 0.0 }
  0xed   :  { %v181_v55 = vadd.f32 %v324_v12, %v180_v53  ;;  %v213_v56 = vadd.f32 %v324_v12, %v212_v54  ;;  %v228_v61 = vmax.f32 %v178_v47, 0.0  ;;  %v236_v62 = vmax.f32 %v210_v48, 0.0 }
  0xee   :  { %v231_v59 = vmax.f32 %v189_v51, 0.0  ;;  %v239_v60 = vmax.f32 %v221_v52, 0.0 }
  0xef   :  { %v229_v63 = vmax.f32 %v181_v55, 0.0  ;;  %v237_v0 = vmax.f32 %v213_v56, 0.0 }
  0xf0   :  { %v394_v1 = vpack.c.bf16 %v231_v59, %v230_v57  ;;  %v414_v2 = vpack.c.bf16 %v239_v60, %v238_v58 }
  0xf1   :  { %v389_v3 = vpack.c.bf16 %v229_v63, %v228_v61  ;;  %v409_v4 = vpack.c.bf16 %v237_v0, %v236_v62 }
  0xf2   :  { %418 = vst [vmem:[%s566_s3 + $0x18] sm:$0xff] %v394_v1   ;;  %422 = vst [vmem:[%s566_s3 + $0x38] sm:$0xff] %v414_v2  }
  0xf3   :  { %417 = vst [vmem:[%s566_s3 + $0x10] sm:$0xff] %v389_v3   ;;  %421 = vst [vmem:[%s566_s3 + $0x30] sm:$0xff] %v409_v4  }

// kernel: basic_block_forward.4
= control target key start
LH: loop header
LB: loop body
LE: loop exit
PB: predicated region body
PF: predicated region fallthrough
CT: control target
= control target key end

     0   :  { %vm104_vm0 = vcmask 1041408   ;;  %vm79_vm1 = vcmask 31744   ;;  %s506_s1 = inlined_call_operand.vmem [shape: bf16[4,128], index: 1, kind: input, shape index: {}]   ;;  %s507_s0 = inlined_call_operand.vmem [shape: bf16[128,4], index: 0, kind: input, shape index: {}]   ;;  %s508_s2 = inlined_call_operand.vmem [shape: f32[1,128], index: 2, kind: input, shape index: {}]   ;;  %s509_s3 = inlined_call_operand.vmem [shape: bf16[128,128], index: 3, kind: output, shape index: {}]  }
   0x1   :  { %v31_v0 = vld [vmem:[%s506_s1] sm:$0x3]  ;;  %v418_v4 = vld [vmem:[%s507_s0 + $0x8] sm:$0xff]   ;;  %v420_v6 = vld [vmem:[%s507_s0 + $0x10] sm:$0xff]  }
   0x2   :  { %414 = vmatprep.subr.msk.bf16.mxu0 %vm104_vm0, %v31_v0  ;;  %415 = vmatprep.subr.msk.bf16.mxu1 %vm104_vm0, %v31_v0  ;;  %v106_v1 = vsel %vm104_vm0, %v31_v0, 0  ;;  %v416_v2 = vld [vmem:[%s507_s0] sm:$0xff]   ;;  %v419_v5 = vld [vmem:[%s507_s0 + $0x28] sm:$0xff]   ;;  %v421_v7 = vld [vmem:[%s507_s0 + $0x30] sm:$0xff]  }
   0x3   :  { %395 = vmatpush3.bf16.msra.mxu0 %v106_v1  ;;  %413 = vmatpush3.bf16.msra.mxu1 %v106_v1  ;;  %v417_v3 = vld [vmem:[%s507_s0 + $0x20] sm:$0xff]   ;;  %v422_v8 = vld [vmem:[%s507_s0 + $0x18] sm:$0xff]  }
   0x4   :  { %396 = vmatprep.mubr.msk.bf16.mxu0 %vm79_vm1, %v416_v2  ;;  %404 = vmatprep.mubr.msk.bf16.mxu1 %vm79_vm1, %v417_v3  ;;  %v423_v9 = vld [vmem:[%s507_s0 + $0x38] sm:$0xff]   ;;  %v289_v11 = vld [vmem:[%s508_s2] ss:$0 sm:$0xff] }
   0x6   :  { %397 = vmatmul.mubr.msk.bf16.vlgmr.msra.gmra.mrb[0].mxu0 %vm79_vm1, %v418_v4  ;;  %405 = vmatmul.mubr.msk.bf16.vlgmr.msra.gmra.mrb[0].mxu1 %vm79_vm1, %v419_v5 }
   0x7   :  { %400 = vmatprep.mubr.msk.bf16.mxu0 %vm79_vm1, %v420_v6  ;;  %408 = vmatprep.mubr.msk.bf16.mxu1 %vm79_vm1, %v421_v7 }
   0xe   :  { %401 = vmatmul.mubr.msk.bf16.gmra.mrb[4].mxu0 %vm79_vm1, %v422_v8  ;;  %409 = vmatmul.mubr.msk.bf16.gmra.mrb[4].mxu1 %vm79_vm1, %v423_v9 }
  0xd9   :  { %v398_v10 = vpop.f32.mrb[0].mxu0  ;;  %v406_v12 = vpop.f32.mrb[0].mxu1 }
  0xda   :  { %v142_v13 = vpop.f32.mrb[1].mxu0  ;;  %v174_v14 = vpop.f32.mrb[1].mxu1  ;;  %v151_v16 = vadd.f32 %v398_v10, %v289_v11  ;;  %v183_v20 = vadd.f32 %v406_v12, %v289_v11 }
  0xdb   :  { %v399_v15 = vpop.f32.mrb[2].mxu0  ;;  %v407_v18 = vpop.f32.mrb[2].mxu1  ;;  %v143_v21 = vadd.f32 %v289_v11, %v142_v13  ;;  %v175_v25 = vadd.f32 %v289_v11, %v174_v14 }
  0xdc   :  { %v154_v17 = vadd.f32 %v399_v15, %v289_v11  ;;  %v145_v19 = vpop.f32.mrb[3].mxu0  ;;  %v186_v22 = vadd.f32 %v407_v18, %v289_v11  ;;  %v177_v24 = vpop.f32.mrb[3].mxu1 }
  0xdd   :  { %v146_v23 = vadd.f32 %v289_v11, %v145_v19  ;;  %v178_v27 = vadd.f32 %v289_v11, %v177_v24 }
  0xde   :  { %v346_v26 = vpack.c.bf16 %v154_v17, %v151_v16  ;;  %v366_v28 = vpack.c.bf16 %v186_v22, %v183_v20 }
  0xdf   :  { %v341_v29 = vpack.c.bf16 %v146_v23, %v143_v21  ;;  %v361_v30 = vpack.c.bf16 %v178_v27, %v175_v25 }
  0xe0   :  { %378 = vst [vmem:[%s509_s3 + $0x8] sm:$0xff] %v346_v26   ;;  %382 = vst [vmem:[%s509_s3 + $0x28] sm:$0xff] %v366_v28  }
  0xe1   :  { %342 = vst [vmem:[%s509_s3] sm:$0xff] %v341_v29   ;;  %v402_v31 = vpop.f32.mrb[4].mxu0  ;;  %381 = vst [vmem:[%s509_s3 + $0x20] sm:$0xff] %v361_v30   ;;  %v410_v32 = vpop.f32.mrb[4].mxu1 }
  0xe2   :  { %v158_v33 = vpop.f32.mrb[5].mxu0  ;;  %v190_v34 = vpop.f32.mrb[5].mxu1  ;;  %v167_v36 = vadd.f32 %v402_v31, %v289_v11  ;;  %v199_v40 = vadd.f32 %v410_v32, %v289_v11 }
  0xe3   :  { %v403_v35 = vpop.f32.mrb[6].mxu0  ;;  %v411_v38 = vpop.f32.mrb[6].mxu1  ;;  %v159_v41 = vadd.f32 %v289_v11, %v158_v33  ;;  %v191_v45 = vadd.f32 %v289_v11, %v190_v34 }
  0xe4   :  { %v170_v37 = vadd.f32 %v403_v35, %v289_v11  ;;  %v161_v39 = vpop.f32.mrb[7].mxu0  ;;  %v202_v42 = vadd.f32 %v411_v38, %v289_v11  ;;  %v193_v44 = vpop.f32.mrb[7].mxu1 }
  0xe5   :  { %v162_v43 = vadd.f32 %v289_v11, %v161_v39  ;;  %v194_v47 = vadd.f32 %v289_v11, %v193_v44 }
  0xe6   :  { %v356_v46 = vpack.c.bf16 %v170_v37, %v167_v36  ;;  %v376_v48 = vpack.c.bf16 %v202_v42, %v199_v40 }
  0xe7   :  { %v351_v49 = vpack.c.bf16 %v162_v43, %v159_v41  ;;  %v371_v50 = vpack.c.bf16 %v194_v47, %v191_v45 }
  0xe8   :  { %380 = vst [vmem:[%s509_s3 + $0x18] sm:$0xff] %v356_v46   ;;  %384 = vst [vmem:[%s509_s3 + $0x38] sm:$0xff] %v376_v48  }
  0xe9   :  { %379 = vst [vmem:[%s509_s3 + $0x10] sm:$0xff] %v351_v49   ;;  %383 = vst [vmem:[%s509_s3 + $0x30] sm:$0xff] %v371_v50  }

// kernel: basic_block_forward.5
= control target key start
LH: loop header
LB: loop body
LE: loop exit
PB: predicated region body
PF: predicated region fallthrough
CT: control target
= control target key end

     0   :  { %s2633_s18 = smov 0   ;;  %s3225_s0 = inlined_call_operand.vmem [shape: bf16[288,8], index: 0, kind: input, shape index: {}, may-alias: {0,1}]   ;;  %s3226_s1 = inlined_call_operand.vmem [shape: bf16[288,8], index: 1, kind: input, shape index: {}, may-alias: {0,1}]   ;;  %s3227_s2 = inlined_call_operand.vmem [shape: bf16[9,8,128], index: 2, kind: input, shape index: {}]   ;;  %s3228_s3 = inlined_call_operand.vmem [shape: f32[1,128], index: 3, kind: input, shape index: {}]   ;;  %s3229_s4 = inlined_call_operand.vmem [shape: bf16[256,128], index: 4, kind: input, shape index: {}]   ;;  %s3230_s5 = inlined_call_operand.vmem [shape: f32[256,128], index: 5, kind: output, shape index: {}]  }
   0x1 LB: > { %s2037_s19 = sadd.s32 4294967295, %s2601_s18   ;;  %p2043_p0 = scmp.ge.s32.totalorder %s2601_s18, 1  ;;  %s2601_s18 = sphi %s2633_s18, %s15_s18  }
   0x2   : > { %p226_p1 = scmp.lt.s32.totalorder %s2601_s18, 3 }
   0x4   : > { %p227_p2 = pnand %p2043_p0, %p226_p1 }
   0x5   : > { %v2063_v0 = vld [vmem:[%s3227_s2 + $0x4] sm:$0xf] (!%p227_p2)  ;;  %vm474_vm0 = vcmask (!%p227_p2), 1043456   ;;  %v2647_v1 = vld [vmem:[%s3227_s2 + $0x10] sm:$0xf] (!%p227_p2)  ;;  %s2649_s24 = sshll.u32 (!%p227_p2), %s2037_s19, 4 }
   0x6   : > { %230 = sbr.rel (%p227_p2) target bundleno = 387 (0x183), region = 40  ;;  %2567 = vmatprep.subr.msk.bf16.mxu1 (!%p227_p2), %vm474_vm0, %v2063_v0  ;;  %2571 = vmatprep.subr.msk.bf16.mxu0 (!%p227_p2), %vm474_vm0, %v2647_v1  ;;  %v476_v2 = vsel (!%p227_p2), %vm474_vm0, %v2063_v0, 0  ;;  %v2657_v3 = vsel (!%p227_p2), %vm474_vm0, %v2647_v1, 0  ;;  %p275_p3 = scmp.lt.s32.totalorder (!%p227_p2), %s2649_s24, 35  ;;  %v377_v4 = vld [vmem:[%s3227_s2] sm:$0xf] (!%p227_p2) }
   0x7   : > { %2276 = vmatpush3.bf16.msra.mxu1 (!%p227_p2), %v476_v2  ;;  %2348 = vmatpush3.bf16.msra.mxu0 (!%p227_p2), %v2657_v3  ;;  %v2107_v5 = vld [vmem:[%s3227_s2 + $0x14] sm:$0xf] (!%p227_p2)  ;;  %s2186_s30 = sadd.s32 (!%p227_p2), 16, %s2649_s24  ;;  %vm380_vm1 = vsmask.f32 (!%p227_p2), 7424  ;;  %vm449_vm2 = vcmask (!%p227_p2), 64512  }
   0x8   : > { %2568 = vmatprep.subr.msk.bf16.mxu1 (!%p227_p2), %vm474_vm0, %v377_v4  ;;  %2573 = vmatprep.subr.msk.bf16.mxu0 (!%p227_p2), %vm474_vm0, %v2107_v5  ;;  %p287_p4 = scmp.lt.s32.totalorder (!%p227_p2), %s2186_s30, 35  ;;  %vm1013_vm3 = vsmask.f32 (!%p227_p2), 2304  ;;  %v592_v8 = vsel (!%p227_p2), %vm474_vm0, %v377_v4, 0  ;;  %v1236_v9 = vsel (!%p227_p2), %vm474_vm0, %v2107_v5, 0  ;;  %vm1193_vm4 = vcmask (!%p227_p2), 1041408  }
   0x9   : > { %v2116_v44 = vld [vmem:[%s3227_s2 + $0x18] sm:$0xf] (!%p227_p2)  ;;  %v2080_v50 = vld [vmem:[%s3227_s2 + $0x8] sm:$0xf] (!%p227_p2)  ;;  %vm1353_vm5 = vcmask (!%p227_p2), 1045504   ;;  %vm693_vm6 = vcmask (!%p227_p2), 1046528  }
   0xa   : > { %vm1513_vm7 = vsmask.f32 (!%p227_p2), 5376  ;;  %vm853_vm8 = vcmask (!%p227_p2), 1042432   ;;  %vm1696_vm9 = vcmask (!%p227_p2), 1044480   ;;  %p295_p5 = scmp.lt.s32.totalorder (!%p227_p2), %s2649_s24, 31 }
   0xd   : > { %s276_s29 = scalar_select %p275_p3, %s2649_s24, 35 }
   0xe   : > { %s3234_s30 = smov (!%p287_p4, %s2186_s30), 35  ;;  %s3236_s24 = smov (!%p295_p5, %s2649_s24), 31 }
   0xf   : > { %s2045_s6 = sshll.u32 %s276_s29, 2  ;;  %s2048_s12 = sshll.u32 %s3234_s30, 2 }
  0x10   : > { %s2674_s9 = scalar_lea.vmem %s3225_s0, %s2045_s6  ;;  %s2754_s15 = scalar_lea.vmem %s3226_s1, %s2048_s12 }
  0x11   : > { %v2677_v6 = vld [vmem:[%s2674_s9] sm:$0xff]   ;;  %v2680_v7 = vld [vmem:[%s2674_s9 + $0x8] sm:$0xff]   ;;  %v2685_v10 = vld [vmem:[%s2674_s9 + $0x10] sm:$0xff]   ;;  %s2050_s26 = sshll.u32 %s3236_s24, 2  ;;  %s2052_s7 = sshll.u32 %s3236_s24, 3 }
  0x12   : > { %v382_v11 = vshrl.u32 %v2677_v6, 16  ;;  %v384_v12 = vshll.u32 %v2677_v6, 16  ;;  %v2692_v13 = vshll.u32 %v2680_v7, 16  ;;  %v2695_v14 = vshrl.u32 %v2680_v7, 16  ;;  %v2704_v17 = vld [vmem:[%s2674_s9 + $0x18] sm:$0xff]   ;;  %v2707_v18 = vld [vmem:[%s2674_s9 + $0x20] sm:$0xff]   ;;  %s3170_s29 = scalar_lea.vmem %s3229_s4, %s2050_s26  ;;  %s3185_s10 = scalar_lea.vmem %s3230_s5, %s2052_s7 }
  0x13   : > { %v2698_v15 = vshll.u32 %v2685_v10, 16  ;;  %v2701_v16 = vshrl.u32 %v2685_v10, 16  ;;  %v2717_v31 = vld [vmem:[%s2674_s9 + $0x28] sm:$0xff]   ;;  %v2721_v34 = vshll.u32 %v2704_v17, 16  ;;  %v2724_v35 = vshrl.u32 %v2704_v17, 16  ;;  %v2749_v49 = vld [vmem:[%s2674_s9 + $0x30] sm:$0xff]  }
  0x14   : > { %v386_v19 = vrot.slane %v384_v12, 1  ;;  %v391_v20 = vrot.slane %v2692_v13, 1  ;;  %v1014_v21 = vrot.slane %v382_v11, 5  ;;  %v1015_v22 = vrot.slane %v384_v12, 6  ;;  %v2766_v55 = vld [vmem:[%s2674_s9 + $0x38] sm:$0xff]   ;;  %v2784_v0 = vld [vmem:[%s2754_s15] sm:$0xff]  }
  0x15   : > { %v1017_v23 = vrot.slane %v2695_v14, 5  ;;  %v1018_v24 = vrot.slane %v2692_v13, 6  ;;  %v399_v25 = vrot.slane %v2698_v15, 1  ;;  %v1021_v26 = vrot.slane %v2701_v16, 5 }
  0x16   : > { %v387_v27 = vor.u32 %v386_v19, %v382_v11  ;;  %v395_v28 = vor.u32 %v2695_v14, %v391_v20  ;;  %v1016_v29 = vor.u32 %v1015_v22, %v1014_v21  ;;  %v1022_v30 = vrot.slane %v2698_v15, 6 }
  0x17   : > { %v1019_v32 = vor.u32 %v1018_v24, %v1017_v23  ;;  %v403_v33 = vor.u32 %v2701_v16, %v399_v25  ;;  %v2729_v39 = vshll.u32 %v2707_v18, 16  ;;  %v407_v41 = vrot.slane %v2721_v34, 1 }
  0x18   : > { %v392_v36 = vsel %vm380_vm1, %v387_v27, %v391_v20  ;;  %v400_v37 = vsel %vm380_vm1, %v395_v28, %v399_v25  ;;  %v1023_v38 = vor.u32 %v1022_v30, %v1021_v26  ;;  %v1025_v42 = vrot.slane %v2724_v35, 5 }
  0x19   : > { %2277 = vmatprep.mubr.msk.bf16.mxu1 %vm449_vm2, %v392_v36  ;;  %v1020_v40 = vsel %vm1013_vm3, %v1016_v29, %v1019_v32  ;;  %v1026_v43 = vrot.slane %v2721_v34, 6  ;;  %v415_v46 = vrot.slane %v2729_v39, 1  ;;  %v2745_v47 = vshrl.u32 %v2707_v18, 16 }
  0x1a   : > { %2349 = vmatprep.mubr.msk.bf16.mxu0 %vm449_vm2, %v1020_v40  ;;  %2278 = vmatmul.mubr.msk.bf16.vlgmr.msra.gmra.mrb[0].mxu1 %vm449_vm2, %v400_v37  ;;  %v1024_v45 = vsel %vm1013_vm3, %v1019_v32, %v1023_v38  ;;  %v1030_v48 = vrot.slane %v2729_v39, 6  ;;  %v408_v51 = vsel %vm380_vm1, %v403_v33, %v407_v41  ;;  %v411_v53 = vor.u32 %v2724_v35, %v407_v41 }
  0x1b   : > { %2294 = vmatpush3.bf16.msra.mxu1 %v592_v8  ;;  %2350 = vmatmul.mubr.msk.bf16.vlgmr.msra.gmra.mrb[0].mxu0 %vm449_vm2, %v1024_v45  ;;  %v1027_v52 = vor.u32 %v1026_v43, %v1025_v42  ;;  %v2763_v54 = vshll.u32 %v2717_v31, 16  ;;  %v1029_v56 = vrot.slane %v2745_v47, 5  ;;  %v419_v57 = vor.u32 %v2745_v47, %v415_v46 }
  0x1c   : > { %2366 = vmatpush3.bf16.msra.mxu0 %v1236_v9  ;;  %2281 = vmatprep.mubr.msk.bf16.mxu1 %vm449_vm2, %v408_v51  ;;  %v1194_v60 = vrot.slane %v2677_v6, 6  ;;  %v1195_v61 = vrot.slane %v2680_v7, 6  ;;  %v2781_v63 = vshll.u32 %v2749_v49, 16  ;;  %v416_v2 = vsel %vm380_vm1, %v411_v53, %v415_v46 }
  0x1d   : > { %v1028_v58 = vsel %vm1013_vm3, %v1023_v38, %v1027_v52  ;;  %v423_v59 = vrot.slane %v2763_v54, 1  ;;  %2574 = vmatprep.subr.msk.bf16.mxu0 %vm474_vm0, %v2116_v44  ;;  %2569 = vmatprep.subr.msk.bf16.mxu1 %vm474_vm0, %v2080_v50  ;;  %v2778_v62 = vor.u32 %v1030_v48, %v1029_v56  ;;  %v2788_v4 = vshrl.u32 %v2717_v31, 16 }
  0x1e   : > { %2353 = vmatprep.mubr.msk.bf16.mxu0 %vm449_vm2, %v1028_v58  ;;  %v2791_v5 = vshll.u32 %v2766_v55, 16  ;;  %v2797_v11 = vshrl.u32 %v2749_v49, 16  ;;  %v1196_v12 = vsel %vm1193_vm4, %v1194_v60, %v1195_v61  ;;  %v431_v19 = vrot.slane %v2781_v63, 1 }
  0x1f   : > { %v1032_v8 = vsel %vm1013_vm3, %v1027_v52, %v2778_v62  ;;  %v424_v9 = vsel %vm380_vm1, %v419_v57, %v423_v59  ;;  %v2804_v21 = vshrl.u32 %v2766_v55, 16  ;;  %v2807_v22 = vshll.u32 %v2784_v0, 16  ;;  %v2843_v52 = vld [vmem:[%s3227_s2 + $0x1c] sm:$0xf] }
  0x20   : > { %v439_v20 = vrot.slane %v2791_v5, 1  ;;  %v427_v23 = vor.u32 %v2788_v4, %v423_v59  ;;  %v1197_v24 = vrot.slane %v2685_v10, 6  ;;  %v435_v25 = vor.u32 %v2797_v11, %v431_v19 }
  0x21   : > { %v1199_v26 = vrot.slane %v2704_v17, 6  ;;  %v1396_v27 = vsel %vm474_vm0, %v2116_v44, 0  ;;  %v1201_v28 = vrot.slane %v2707_v18, 6  ;;  %v447_v30 = vrot.slane %v2807_v22, 1 }
  0x22   : > { %2282 = vmatmul.mubr.msk.bf16.gmra.mrb[4].mxu1 %vm449_vm2, %v416_v2  ;;  %v443_v29 = vor.u32 %v2804_v21, %v439_v20  ;;  %v1203_v32 = vrot.slane %v2717_v31, 6  ;;  %v1205_v33 = vrot.slane %v2749_v49, 6  ;;  %v432_v36 = vsel %vm380_vm1, %v427_v23, %v431_v19 }
  0x23   : > { %2354 = vmatmul.mubr.msk.bf16.gmra.mrb[4].mxu0 %vm449_vm2, %v1032_v8  ;;  %2285 = vmatprep.mubr.msk.bf16.mxu1 %vm449_vm2, %v424_v9  ;;  %v2824_v37 = vsel %vm474_vm0, %v2080_v50, 0  ;;  %v1198_v38 = vsel %vm1193_vm4, %v1195_v61, %v1197_v24  ;;  %v440_v40 = vsel %vm380_vm1, %v435_v25, %v439_v20  ;;  %v1200_v41 = vsel %vm1193_vm4, %v1197_v24, %v1199_v26 }
  0x24   : > { %2367 = vmatprep.mubr.msk.bf16.mxu0 %vm449_vm2, %v1196_v12  ;;  %v1207_v42 = vrot.slane %v2766_v55, 6  ;;  %v1202_v43 = vsel %vm1193_vm4, %v1199_v26, %v1201_v28  ;;  %v1209_v44 = vrot.slane %v2784_v0, 6  ;;  %v3231_v45 = vrot.slane %v2685_v10, 1 }
  0x25   : > { %v699_v46 = vrot.slane %v2704_v17, 1  ;;  %v448_v48 = vsel %vm380_vm1, %v443_v29, %v447_v30  ;;  %v1204_v50 = vsel %vm1193_vm4, %v1201_v28, %v1203_v32  ;;  %v2838_v51 = vsel %vm1193_vm4, %v1203_v32, %v1205_v33 }
  0x26   : > { %v701_v53 = vrot.slane %v2707_v18, 1  ;;  %v1354_v56 = vrot.slane %v2680_v7, 2  ;;  %v1355_v57 = vrot.slane %v2685_v10, 2  ;;  %v703_v59 = vrot.slane %v2717_v31, 1 }
  0x27   : > { %v2853_v58 = vsel %vm693_vm6, %v3231_v45, %v699_v46  ;;  %v2858_v60 = vsel %vm1193_vm4, %v1205_v33, %v1207_v42  ;;  %v1514_v2 = vrot.slane %v2695_v14, 2  ;;  %v1515_v8 = vrot.slane %v2692_v13, 3 }
  0x28   : > { %v2861_v61 = vsel %vm693_vm6, %v699_v46, %v701_v53  ;;  %v2866_v9 = vsel %vm1193_vm4, %v1207_v42, %v1209_v44  ;;  %v2871_v12 = vsel %vm693_vm6, %v701_v53, %v703_v59  ;;  %v1517_v19 = vrot.slane %v2701_v16, 2 }
  0x29   : > { %v1518_v20 = vrot.slane %v2698_v15, 3  ;;  %v1516_v23 = vor.u32 %v1515_v8, %v1514_v2  ;;  %v705_v24 = vrot.slane %v2749_v49, 1  ;;  %v1521_v14 = vrot.slane %v2724_v35, 2 }
  0x2a   : > { %2286 = vmatmul.mubr.msk.bf16.gmra.mrb[8].mxu1 %vm449_vm2, %v432_v36  ;;  %v1522_v13 = vrot.slane %v2721_v34, 3  ;;  %v2881_v25 = vsel %vm1353_vm5, %v1354_v56, %v1355_v57  ;;  %v1525_v28 = vrot.slane %v2745_v47, 2  ;;  %v1526_v29 = vrot.slane %v2729_v39, 3  ;;  %v2920_v56 = vld [vmem:[%s2754_s15 + $0x8] sm:$0xff]  }
  0x2b   : > { %2368 = vmatmul.mubr.msk.bf16.vlgmr.msra.gmra.mrb[0].mxu0 %vm449_vm2, %v1198_v38  ;;  %2289 = vmatprep.mubr.msk.bf16.mxu1 %vm449_vm2, %v440_v40  ;;  %v1519_v26 = vor.u32 %v1518_v20, %v1517_v19  ;;  %v2886_v16 = vsel %vm693_vm6, %v703_v59, %v705_v24  ;;  %v709_v35 = vrot.slane %v2784_v0, 1  ;;  %v1529_v32 = vrot.slane %v2788_v4, 2 }
  0x2c   : > { %2384 = vmatpush3.bf16.msra.mxu0 %v1396_v27  ;;  %2371 = vmatprep.mubr.msk.bf16.mxu0 %vm449_vm2, %v1200_v41  ;;  %v707_v27 = vrot.slane %v2766_v55, 1  ;;  %v1523_v15 = vor.u32 %v1522_v13, %v1521_v14  ;;  %v1530_v33 = vrot.slane %v2763_v54, 3  ;;  %v1527_v39 = vor.u32 %v1526_v29, %v1525_v28 }
  0x2d   : > { %2575 = vmatprep.subr.msk.bf16.mxu0 %vm474_vm0, %v2843_v52  ;;  %v2891_v34 = vsel %vm1513_vm7, %v1516_v23, %v1519_v26  ;;  %v854_v38 = vrot.slane %v2677_v6, 5  ;;  %v855_v41 = vrot.slane %v2680_v7, 5  ;;  %v1533_v42 = vrot.slane %v2797_v11, 2 }
  0x2e   : > { %v2894_v30 = vsel %vm693_vm6, %v705_v24, %v707_v27  ;;  %v2900_v47 = vsel %vm1513_vm7, %v1519_v26, %v1523_v15  ;;  %v2903_v36 = vsel %vm693_vm6, %v707_v27, %v709_v35  ;;  %v1531_v40 = vor.u32 %v1530_v33, %v1529_v32 }
  0x2f   : > { %v1534_v44 = vrot.slane %v2781_v63, 3  ;;  %v2914_v46 = vsel %vm1513_vm7, %v1523_v15, %v1527_v39  ;;  %v1537_v53 = vrot.slane %v2804_v21, 2  ;;  %v2926_v2 = vsel %vm853_vm8, %v854_v38, %v855_v41 }
  0x30   : > { %v2923_v59 = vsel %vm1513_vm7, %v1527_v39, %v1531_v40  ;;  %v1045_v23 = vshrl.u32 %v2784_v0, 16  ;;  %v1542_v24 = vrot.slane %v2807_v22, 3  ;;  %v861_v26 = vrot.slane %v2707_v18, 5 }
  0x31   : > { %v1535_v8 = vor.u32 %v1534_v44, %v1533_v42  ;;  %v1546_v27 = vshrl.u32 %v2920_v56, 16  ;;  %v1549_v29 = vshll.u32 %v2920_v56, 16  ;;  %v863_v35 = vrot.slane %v2717_v31, 5 }
  0x32   : > { %2290 = vmatmul.mubr.msk.bf16.gmra.mrb[12].mxu1 %vm449_vm2, %v448_v48  ;;  %v857_v48 = vrot.slane %v2685_v10, 5  ;;  %v1541_v15 = vrot.slane %v1045_v23, 2  ;;  %v1697_v39 = vrot.slane %v2680_v7, 3  ;;  %v1698_v38 = vrot.slane %v2685_v10, 3 }
  0x33   : > { %2372 = vmatmul.mubr.msk.bf16.gmra.mrb[4].mxu0 %vm449_vm2, %v1202_v43  ;;  %2295 = vmatprep.mubr.msk.bf16.mxu1 %vm449_vm2, %v2677_v6  ;;  %v1538_v43 = vrot.slane %v2791_v5, 3  ;;  %v2935_v14 = vsel %vm1513_vm7, %v1531_v40, %v1535_v8  ;;  %v1548_v33 = vrot.slane %v1546_v27, 2  ;;  %v2957_v40 = vld [vmem:[%s3227_s2 + $0xc] sm:$0xf]  ;;  %v1551_v42 = vrot.slane %v1549_v29, 3 }
  0x34   : > { %2375 = vmatprep.mubr.msk.bf16.mxu0 %vm449_vm2, %v1204_v50  ;;  %v859_v50 = vrot.slane %v2704_v17, 5  ;;  %v2930_v19 = vsel %vm853_vm8, %v855_v41, %v857_v48  ;;  %v1543_v41 = vor.u32 %v1542_v24, %v1541_v15  ;;  %v2960_v44 = vsel %vm853_vm8, %v861_v26, %v863_v35 }
  0x35   : > { %v1539_v20 = vor.u32 %v1538_v43, %v1537_v53  ;;  %v2967_v53 = vsel %vm1696_vm9, %v1697_v39, %v1698_v38  ;;  %v1700_v43 = vrot.slane %v2704_v17, 3  ;;  %v1552_v24 = vor.u32 %v1551_v42, %v1548_v33 }
  0x36   : > { %v2938_v13 = vsel %vm853_vm8, %v857_v48, %v859_v50  ;;  %v2948_v32 = vsel %vm853_vm8, %v859_v50, %v861_v26  ;;  %v865_v48 = vrot.slane %v2749_v49, 5  ;;  %v1702_v50 = vrot.slane %v2707_v18, 3 }
  0x37   : > { %v2943_v28 = vsel %vm1513_vm7, %v1535_v8, %v1539_v20  ;;  %v867_v8 = vrot.slane %v2766_v55, 5  ;;  %v869_v26 = vrot.slane %v2784_v0, 5  ;;  %v2986_v27 = vsel %vm1696_vm9, %v1698_v38, %v1700_v43 }
  0x38   : > { %v2996_v29 = vsel %vm1513_vm7, %v1543_v41, %v1552_v24  ;;  %v1033_v33 = vrot.slane %v2788_v4, 5  ;;  %v1034_v39 = vrot.slane %v2763_v54, 6  ;;  %v1706_v42 = vrot.slane %v2749_v49, 3 }
  0x39   : > { %v2989_v15 = vsel %vm853_vm8, %v865_v48, %v867_v8  ;;  %v1041_v24 = vrot.slane %v2804_v21, 5 }
  0x3a   : > { %2296 = vmatmul.mubr.msk.bf16.vlgmr.msra.gmra.mrb[0].mxu1 %vm449_vm2, %v2680_v7  ;;  %v1035_v45 = vor.u32 %v1034_v39, %v1033_v33  ;;  %v1357_v33 = vrot.slane %v2704_v17, 2  ;;  %v1359_v39 = vrot.slane %v2707_v18, 2 }
  0x3b   : > { %2312 = vmatpush3.bf16.msra.mxu1 %v2824_v37  ;;  %2376 = vmatmul.mubr.msk.bf16.gmra.mrb[8].mxu0 %vm449_vm2, %v2838_v51  ;;  %v2977_v37 = vsel %vm1513_vm7, %v1539_v20, %v1543_v41  ;;  %v2980_v51 = vsel %vm853_vm8, %v863_v35, %v865_v48  ;;  %v1704_v20 = vrot.slane %v2717_v31, 3  ;;  %v2999_v35 = vsel %vm853_vm8, %v867_v8, %v869_v26 }
  0x3c   : > { %2299 = vmatprep.mubr.msk.bf16.mxu1 %vm449_vm2, %v2685_v10  ;;  %2379 = vmatprep.mubr.msk.bf16.mxu0 %vm449_vm2, %v2858_v60  ;;  %v2992_v60 = vsel %vm1696_vm9, %v1700_v43, %v1702_v50  ;;  %v1037_v48 = vrot.slane %v2797_v11, 5  ;;  %v1038_v43 = vrot.slane %v2781_v63, 6  ;;  %v1708_v41 = vrot.slane %v2766_v55, 3 }
  0x3d   : > { %2570 = vmatprep.subr.msk.bf16.mxu1 %vm474_vm0, %v2957_v40  ;;  %v3004_v38 = vsel %vm1696_vm9, %v1702_v50, %v1704_v20  ;;  %v1042_v8 = vrot.slane %v2791_v5, 6  ;;  %v3013_v4 = vsel %vm1696_vm9, %v1704_v20, %v1706_v42  ;;  %v1710_v50 = vrot.slane %v2784_v0, 3 }
  0x3e   : > { %v1039_v54 = vor.u32 %v1038_v43, %v1037_v48  ;;  %v1047_v26 = vrot.slane %v1045_v23, 5  ;;  %v3020_v63 = vsel %vm1013_vm3, %v2778_v62, %v1035_v45  ;;  %v3023_v11 = vsel %vm1696_vm9, %v1706_v42, %v1708_v41 }
  0x3f   : > { %v1043_v21 = vor.u32 %v1042_v8, %v1041_v24  ;;  %v1048_v5 = vrot.slane %v2807_v22, 6  ;;  %v3034_v20 = vsel %vm1696_vm9, %v1708_v41, %v1710_v50  ;;  %v1712_v62 = vrot.slane %v2920_v56, 3 }
  0x40   : > { %v3031_v23 = vsel %vm1013_vm3, %v1035_v45, %v1039_v54  ;;  %v1358_v48 = vsel %vm1353_vm5, %v1355_v57, %v1357_v33  ;;  %v1361_v57 = vrot.slane %v2717_v31, 2  ;;  %v695_v43 = vrot.slane %v2680_v7, 1 }
  0x41   : > { %v3041_v22 = vsel %vm1013_vm3, %v1039_v54, %v1043_v21  ;;  %v3045_v42 = vsel %vm1696_vm9, %v1710_v50, %v1712_v62  ;;  %v1363_v41 = vrot.slane %v2749_v49, 2  ;;  %v1367_v7 = vrot.slane %v2784_v0, 2 }
  0x42   : > { %2300 = vmatmul.mubr.msk.bf16.gmra.mrb[4].mxu1 %vm449_vm2, %v2704_v17  ;;  %v1360_v17 = vsel %vm1353_vm5, %v1357_v33, %v1359_v39  ;;  %v1362_v24 = vsel %vm1353_vm5, %v1359_v39, %v1361_v57  ;;  %v896_v50 = vsel %vm474_vm0, %v2957_v40, 0 }
  0x43   : > { %2380 = vmatmul.mubr.msk.bf16.gmra.mrb[12].mxu0 %vm449_vm2, %v2866_v9  ;;  %2303 = vmatprep.mubr.msk.bf16.mxu1 %vm449_vm2, %v2707_v18  ;;  %v1049_v9 = vor.u32 %v1048_v5, %v1047_v26  ;;  %v2134_v18 = vld [vmem:[%s3227_s2 + $0x20] sm:$0xf]  ;;  %v1364_v54 = vsel %vm1353_vm5, %v1361_v57, %v1363_v41 }
  0x44   : > { %2385 = vmatprep.mubr.msk.bf16.mxu0 %vm449_vm2, %v2881_v25  ;;  %v1579_v25 = vsel %vm474_vm0, %v2843_v52, 0  ;;  %v694_v52 = vrot.slane %v2677_v6, 1  ;;  %v1365_v6 = vrot.slane %v2766_v55, 2  ;;  %v1739_v0 = vsel %vm474_vm0, %v2134_v18, 0 }
  0x45   : > { %v3048_v45 = vsel %vm1013_vm3, %v1043_v21, %v1049_v9 }
  0x46   : > { %v696_v8 = vsel %vm693_vm6, %v694_v52, %v695_v43  ;;  %v1366_v26 = vsel %vm1353_vm5, %v1363_v41, %v1365_v6  ;;  %v1368_v21 = vsel %vm1353_vm5, %v1365_v6, %v1367_v7 }
  0x4a   : > { %2304 = vmatmul.mubr.msk.bf16.gmra.mrb[8].mxu1 %vm449_vm2, %v2717_v31  ;;  %v3232_v31 = vrot.slane %v2685_v10, 1  ;;  %v1369_v10 = vrot.slane %v2920_v56, 2  ;;  %v3177_v56 = vld [vmem:[%s3228_s3] ss:$0 sm:$0xff] }
  0x4b   : > { %2386 = vmatmul.mubr.msk.bf16.vlgmr.msra.gmra.mrb[0].mxu0 %vm449_vm2, %v1358_v48  ;;  %2307 = vmatprep.mubr.msk.bf16.mxu1 %vm449_vm2, %v2749_v49 }
  0x4c   : > { %2402 = vmatpush3.bf16.msra.mxu0 %v1579_v25  ;;  %2389 = vmatprep.mubr.msk.bf16.mxu0 %vm449_vm2, %v1360_v17  ;;  %v698_v49 = vsel %vm693_vm6, %v695_v43, %v3232_v31 }
  0x4d   : > { %2576 = vmatprep.subr.msk.bf16.mxu0 %vm474_vm0, %v2134_v18 }
  0x52   : > { %2308 = vmatmul.mubr.msk.bf16.gmra.mrb[12].mxu1 %vm449_vm2, %v2766_v55  ;;  %v1370_v55 = vsel %vm1353_vm5, %v1367_v7, %v1369_v10  ;;  %v2191_v7 = vld [vmem:[%s3170_s29 + $0x28] sm:$0xff]  }
  0x53   : > { %2390 = vmatmul.mubr.msk.bf16.gmra.mrb[4].mxu0 %vm449_vm2, %v1362_v24  ;;  %2313 = vmatprep.mubr.msk.bf16.mxu1 %vm449_vm2, %v696_v8 }
  0x54   : > { %2393 = vmatprep.mubr.msk.bf16.mxu0 %vm449_vm2, %v1364_v54 }
  0x5a   : > { %2314 = vmatmul.mubr.msk.bf16.vlgmr.msra.gmra.mrb[0].mxu1 %vm449_vm2, %v698_v49 }
  0x5b   : > { %2330 = vmatpush3.bf16.msra.mxu1 %v896_v50  ;;  %2394 = vmatmul.mubr.msk.bf16.gmra.mrb[8].mxu0 %vm449_vm2, %v1366_v26  ;;  %v2190_v26 = vld [vmem:[%s3170_s29 + $0x20] sm:$0xff]  }
  0x5c   : > { %2317 = vmatprep.mubr.msk.bf16.mxu1 %vm449_vm2, %v2853_v58  ;;  %2397 = vmatprep.mubr.msk.bf16.mxu0 %vm449_vm2, %v1368_v21 }
  0x5d   : > { %2572 = vmatprep.subr.msk.bf16.mxu1 %vm474_vm0, %v2647_v1 }
  0x62   : > { %2318 = vmatmul.mubr.msk.bf16.gmra.mrb[4].mxu1 %vm449_vm2, %v2861_v61 }
  0x63   : > { %2398 = vmatmul.mubr.msk.bf16.gmra.mrb[12].mxu0 %vm449_vm2, %v1370_v55  ;;  %2321 = vmatprep.mubr.msk.bf16.mxu1 %vm449_vm2, %v2871_v12 }
  0x64   : > { %2403 = vmatprep.mubr.msk.bf16.mxu0 %vm449_vm2, %v2891_v34 }
  0x6a   : > { %2322 = vmatmul.mubr.msk.bf16.gmra.mrb[8].mxu1 %vm449_vm2, %v2886_v16 }
  0x6b   : > { %2404 = vmatmul.mubr.msk.bf16.vlgmr.msra.gmra.mrb[0].mxu0 %vm449_vm2, %v2900_v47  ;;  %2325 = vmatprep.mubr.msk.bf16.mxu1 %vm449_vm2, %v2894_v30  ;;  %v2187_v47 = vld [vmem:[%s3170_s29 + $0x8] sm:$0xff]  }
  0x6c   : > { %2420 = vmatpush3.bf16.msra.mxu0 %v1739_v0  ;;  %2407 = vmatprep.mubr.msk.bf16.mxu0 %vm449_vm2, %v2914_v46 }
  0x72   : > { %2326 = vmatmul.mubr.msk.bf16.gmra.mrb[12].mxu1 %vm449_vm2, %v2903_v36  ;;  %v2154_v36 = vld [vmem:[%s3170_s29] sm:$0xff]  }
  0x73   : > { %2408 = vmatmul.mubr.msk.bf16.gmra.mrb[4].mxu0 %vm449_vm2, %v2923_v59  ;;  %2331 = vmatprep.mubr.msk.bf16.mxu1 %vm449_vm2, %v2926_v2  ;;  %v2159_v2 = vunpack.c.l.bf16 %v2187_v47 }
  0x74   : > { %2411 = vmatprep.mubr.msk.bf16.mxu0 %vm449_vm2, %v2935_v14 }
  0x7a   : > { %2332 = vmatmul.mubr.msk.bf16.vlgmr.msra.gmra.mrb[0].mxu1 %vm449_vm2, %v2930_v19 }
  0x7b   : > { %2438 = vmatpush3.bf16.msra.mxu1 %v2657_v3  ;;  %2412 = vmatmul.mubr.msk.bf16.gmra.mrb[8].mxu0 %vm449_vm2, %v2943_v28 }
  0x7c   : > { %2335 = vmatprep.mubr.msk.bf16.mxu1 %vm449_vm2, %v2938_v13  ;;  %2415 = vmatprep.mubr.msk.bf16.mxu0 %vm449_vm2, %v2977_v37  ;;  %v2155_v13 = vunpack.c.l.bf16 %v2154_v36 }
  0x82   : > { %2336 = vmatmul.mubr.msk.bf16.gmra.mrb[4].mxu1 %vm449_vm2, %v2948_v32 }
  0x83   : > { %2416 = vmatmul.mubr.msk.bf16.gmra.mrb[12].mxu0 %vm449_vm2, %v2996_v29  ;;  %2339 = vmatprep.mubr.msk.bf16.mxu1 %vm449_vm2, %v2960_v44  ;;  %v2160_v44 = vunpack.c.h.bf16 %v2187_v47 }
  0x84   : > { %2421 = vmatprep.mubr.msk.bf16.mxu0 %vm449_vm2, %v2967_v53 }
  0x8a   : > { %2340 = vmatmul.mubr.msk.bf16.gmra.mrb[8].mxu1 %vm449_vm2, %v2980_v51 }
  0x8b   : > { %2422 = vmatmul.mubr.msk.bf16.vlgmr.msra.gmra.mrb[0].mxu0 %vm449_vm2, %v2986_v27  ;;  %2343 = vmatprep.mubr.msk.bf16.mxu1 %vm449_vm2, %v2989_v15  ;;  %v2156_v27 = vunpack.c.h.bf16 %v2154_v36 }
  0x8c   : > { %2425 = vmatprep.mubr.msk.bf16.mxu0 %vm449_vm2, %v2992_v60 }
  0x92   : > { %2344 = vmatmul.mubr.msk.bf16.gmra.mrb[12].mxu1 %vm449_vm2, %v2999_v35 }
  0x93   : > { %2426 = vmatmul.mubr.msk.bf16.gmra.mrb[4].mxu0 %vm449_vm2, %v3004_v38  ;;  %2357 = vmatprep.mubr.msk.bf16.mxu1 %vm449_vm2, %v3020_v63  ;;  %v2189_v38 = vld [vmem:[%s3170_s29 + $0x18] sm:$0xff]  }
  0x94   : > { %2429 = vmatprep.mubr.msk.bf16.mxu0 %vm449_vm2, %v3013_v4  ;;  %v2168_v18 = vunpack.c.h.bf16 %v2189_v38 }
  0x9a   : > { %2358 = vmatmul.mubr.msk.bf16.vlgmr.msra.gmra.mrb[8].mxu1 %vm449_vm2, %v3031_v23 }
  0x9b   : > { %2430 = vmatmul.mubr.msk.bf16.gmra.mrb[8].mxu0 %vm449_vm2, %v3023_v11  ;;  %2361 = vmatprep.mubr.msk.bf16.mxu1 %vm449_vm2, %v3041_v22  ;;  %v2188_v11 = vld [vmem:[%s3170_s29 + $0x10] sm:$0xff]   ;;  %v2167_v22 = vunpack.c.l.bf16 %v2189_v38 }
  0x9c   : > { %2433 = vmatprep.mubr.msk.bf16.mxu0 %vm449_vm2, %v3034_v20  ;;  %v2164_v41 = vunpack.c.h.bf16 %v2188_v11 }
  0xa2   : > { %2362 = vmatmul.mubr.msk.bf16.gmra.mrb[12].mxu1 %vm449_vm2, %v3048_v45  ;;  %v2163_v45 = vunpack.c.l.bf16 %v2188_v11 }
  0xa3   : > { %2434 = vmatmul.mubr.msk.bf16.gmra.mrb[12].mxu0 %vm449_vm2, %v3045_v42 }
 0x14d   : > { %v2333_v1 = vpop.f32.mrb[0].mxu1 }
 0x14e   : > { %v932_v3 = vpop.f32.mrb[1].mxu1 }
 0x14f   : > { %v2334_v58 = vpop.f32.mrb[2].mxu1 }
 0x150   : > { %v935_v61 = vpop.f32.mrb[3].mxu1 }
 0x155   : > { %v2337_v12 = vpop.f32.mrb[4].mxu1 }
 0x156   : > { %v948_v16 = vpop.f32.mrb[5].mxu1 }
 0x157   : > { %v2338_v34 = vpop.f32.mrb[6].mxu1 }
 0x158   : > { %v951_v30 = vpop.f32.mrb[7].mxu1 }
 0x15e   : > { %v2423_v46 = vpop.f32.mrb[0].mxu0 }
 0x15f   : > { %v2439_v59 = vadd.f32 %v2423_v46, %v2333_v1  ;;  %v1775_v19 = vpop.f32.mrb[1].mxu0 }
 0x160   : > { %v2440_v14 = vadd.f32 %v1775_v19, %v932_v3  ;;  %v2424_v28 = vpop.f32.mrb[2].mxu0 }
 0x161   : > { %v1863_v32 = vadd.f32 %v2439_v59, %v3177_v56  ;;  %v2441_v40 = vadd.f32 %v2424_v28, %v2334_v58  ;;  %v1778_v53 = vpop.f32.mrb[3].mxu0  ;;  %v2175_v58 = vunpack.c.l.bf16 %v2191_v7  ;;  %v2172_v28 = vunpack.c.h.bf16 %v2190_v26 }
 0x162   : > { %v1861_v37 = vadd.f32 %v2440_v14, %v3177_v56  ;;  %v2442_v51 = vadd.f32 %v1778_v53, %v935_v61 }
 0x163   : > { %v1911_v15 = vadd.f32 %v2159_v2, %v1863_v32  ;;  %v1864_v60 = vadd.f32 %v2441_v40, %v3177_v56  ;;  %v2176_v2 = vunpack.c.h.bf16 %v2191_v7 }
 0x164   : > { %v1909_v29 = vadd.f32 %v2155_v13, %v1861_v37  ;;  %v1862_v35 = vadd.f32 %v2442_v51, %v3177_v56  ;;  %v2193_v37 = vld [vmem:[%s3170_s29 + $0x38] sm:$0xff]  }
 0x165   : > { %v1927_v4 = vmax.f32 %v1911_v15, 0.0  ;;  %v1912_v63 = vadd.f32 %v2160_v44, %v1864_v60  ;;  %v2192_v60 = vld [vmem:[%s3170_s29 + $0x30] sm:$0xff]  }
 0x166   : > { %v1925_v5 = vmax.f32 %v1909_v29, 0.0  ;;  %v1910_v23 = vadd.f32 %v2156_v27, %v1862_v35  ;;  %v2427_v20 = vpop.f32.mrb[4].mxu0 }
 0x167   : > { %1943 = vst [vmem:[%s3185_s10 + $0x10] sm:$0xff] %v1927_v4  ;;  %v1928_v62 = vmax.f32 %v1912_v63, 0.0  ;;  %v2443_v33 = vadd.f32 %v2427_v20, %v2337_v12  ;;  %v1791_v9 = vpop.f32.mrb[5].mxu0 }
 0x168   : > { %1941 = vst [vmem:[%s3185_s10] sm:$0xff] %v1925_v5  ;;  %v1926_v39 = vmax.f32 %v1910_v23, 0.0  ;;  %v2444_v42 = vadd.f32 %v1791_v9, %v948_v16  ;;  %v2428_v48 = vpop.f32.mrb[6].mxu0  ;;  %v2183_v5 = vunpack.c.l.bf16 %v2193_v37 }
 0x169   : > { %1944 = vst [vmem:[%s3185_s10 + $0x18] sm:$0xff] %v1928_v62  ;;  %v1867_v25 = vadd.f32 %v2443_v33, %v3177_v56  ;;  %v2445_v17 = vadd.f32 %v2428_v48, %v2338_v34  ;;  %v1794_v57 = vpop.f32.mrb[7].mxu0  ;;  %v2184_v48 = vunpack.c.h.bf16 %v2193_v37 }
 0x16a   : > { %1942 = vst [vmem:[%s3185_s10 + $0x8] sm:$0xff] %v1926_v39  ;;  %v1865_v52 = vadd.f32 %v2444_v42, %v3177_v56  ;;  %v2446_v43 = vadd.f32 %v1794_v57, %v951_v30  ;;  %v2171_v30 = vunpack.c.l.bf16 %v2190_v26  ;;  %v2180_v57 = vunpack.c.h.bf16 %v2192_v60 }
 0x16b   : > { %v1915_v24 = vadd.f32 %v2167_v22, %v1867_v25  ;;  %v1868_v8 = vadd.f32 %v2445_v17, %v3177_v56  ;;  %v2179_v22 = vunpack.c.l.bf16 %v2192_v60 }
 0x16c   : > { %v1913_v54 = vadd.f32 %v2163_v45, %v1865_v52  ;;  %v1866_v6 = vadd.f32 %v2446_v43, %v3177_v56 }
 0x16d   : > { %v1931_v31 = vmax.f32 %v1915_v24, 0.0  ;;  %v1916_v49 = vadd.f32 %v2168_v18, %v1868_v8  ;;  %v2359_v50 = vpop.f32.mrb[8].mxu1 }
 0x16e   : > { %v1929_v21 = vmax.f32 %v1913_v54, 0.0  ;;  %v1914_v10 = vadd.f32 %v2164_v41, %v1866_v6  ;;  %v2431_v55 = vpop.f32.mrb[8].mxu0  ;;  %v1144_v0 = vpop.f32.mrb[9].mxu1 }
 0x16f   : > { %1947 = vst [vmem:[%s3185_s10 + $0x30] sm:$0xff] %v1931_v31  ;;  %v1932_v1 = vmax.f32 %v1916_v49, 0.0  ;;  %v2447_v3 = vadd.f32 %v2431_v55, %v2359_v50  ;;  %v1807_v61 = vpop.f32.mrb[9].mxu0  ;;  %v2360_v12 = vpop.f32.mrb[10].mxu1 }
 0x170   : > { %1945 = vst [vmem:[%s3185_s10 + $0x20] sm:$0xff] %v1929_v21  ;;  %v1930_v16 = vmax.f32 %v1914_v10, 0.0  ;;  %v2448_v34 = vadd.f32 %v1807_v61, %v1144_v0  ;;  %v2432_v47 = vpop.f32.mrb[10].mxu0  ;;  %v1147_v36 = vpop.f32.mrb[11].mxu1 }
 0x171   : > { %1948 = vst [vmem:[%s3185_s10 + $0x38] sm:$0xff] %v1932_v1  ;;  %v1871_v46 = vadd.f32 %v2447_v3, %v3177_v56  ;;  %v2449_v59 = vadd.f32 %v2432_v47, %v2360_v12  ;;  %v1810_v19 = vpop.f32.mrb[11].mxu0 }
 0x172   : > { %1946 = vst [vmem:[%s3185_s10 + $0x28] sm:$0xff] %v1930_v16  ;;  %v1869_v14 = vadd.f32 %v2448_v34, %v3177_v56  ;;  %v2450_v13 = vadd.f32 %v1810_v19, %v1147_v36 }
 0x173   : > { %v1919_v32 = vadd.f32 %v2175_v58, %v1871_v46  ;;  %v1872_v40 = vadd.f32 %v2449_v59, %v3177_v56 }
 0x174   : > { %v1917_v44 = vadd.f32 %v2171_v30, %v1869_v14  ;;  %v1870_v53 = vadd.f32 %v2450_v13, %v3177_v56 }
 0x175   : > { %v1935_v51 = vmax.f32 %v1919_v32, 0.0  ;;  %v1920_v27 = vadd.f32 %v2176_v2, %v1872_v40  ;;  %v2363_v15 = vpop.f32.mrb[12].mxu1 }
 0x176   : > { %v1933_v29 = vmax.f32 %v1917_v44, 0.0  ;;  %v1918_v35 = vadd.f32 %v2172_v28, %v1870_v53  ;;  %v2435_v38 = vpop.f32.mrb[12].mxu0  ;;  %v1160_v4 = vpop.f32.mrb[13].mxu1 }
 0x177   : > { %1951 = vst [vmem:[%s3185_s10 + $0x50] sm:$0xff] %v1935_v51  ;;  %v1936_v63 = vmax.f32 %v1920_v27, 0.0  ;;  %v2451_v11 = vadd.f32 %v2435_v38, %v2363_v15  ;;  %v1823_v23 = vpop.f32.mrb[13].mxu0  ;;  %v2364_v20 = vpop.f32.mrb[14].mxu1 }
 0x178   : > { %1949 = vst [vmem:[%s3185_s10 + $0x40] sm:$0xff] %v1933_v29  ;;  %v1934_v62 = vmax.f32 %v1918_v35, 0.0  ;;  %v2452_v33 = vadd.f32 %v1823_v23, %v1160_v4  ;;  %v2436_v9 = vpop.f32.mrb[14].mxu0  ;;  %v1163_v39 = vpop.f32.mrb[15].mxu1 }
 0x179   : > { %1952 = vst [vmem:[%s3185_s10 + $0x58] sm:$0xff] %v1936_v63  ;;  %v1875_v42 = vadd.f32 %v2451_v11, %v3177_v56  ;;  %v2453_v45 = vadd.f32 %v2436_v9, %v2364_v20  ;;  %v1826_v25 = vpop.f32.mrb[15].mxu0 }
 0x17a   : > { %1950 = vst [vmem:[%s3185_s10 + $0x48] sm:$0xff] %v1934_v62  ;;  %v1873_v17 = vadd.f32 %v2452_v33, %v3177_v56  ;;  %v2454_v18 = vadd.f32 %v1826_v25, %v1163_v39 }
 0x17b   : > { %v1923_v52 = vadd.f32 %v2183_v5, %v1875_v42  ;;  %v1876_v43 = vadd.f32 %v2453_v45, %v3177_v56 }
 0x17c   : > { %v1921_v41 = vadd.f32 %v2179_v22, %v1873_v17  ;;  %v1874_v24 = vadd.f32 %v2454_v18, %v3177_v56 }
 0x17d   : > { %v1939_v8 = vmax.f32 %v1923_v52, 0.0  ;;  %v1924_v54 = vadd.f32 %v2184_v48, %v1876_v43 }
 0x17e   : > { %v1937_v6 = vmax.f32 %v1921_v41, 0.0  ;;  %v1922_v7 = vadd.f32 %v2180_v57, %v1874_v24 }
 0x17f   : > { %1955 = vst [vmem:[%s3185_s10 + $0x70] sm:$0xff] %v1939_v8  ;;  %v1940_v31 = vmax.f32 %v1924_v54, 0.0 }
 0x180   : > { %1953 = vst [vmem:[%s3185_s10 + $0x60] sm:$0xff] %v1937_v6  ;;  %v1938_v49 = vmax.f32 %v1922_v7, 0.0 }
 0x181   : > { %1956 = vst [vmem:[%s3185_s10 + $0x78] sm:$0xff] %v1940_v31 }
 0x182   : > { %1954 = vst [vmem:[%s3185_s10 + $0x68] sm:$0xff] %v1938_v49 }
 0x183 PF: > { %s15_s18 = sadd.s32 1, %s2601_s18  }
 0x184   : > { %p12_p6 = scmp.ge.s32.totalorder %s15_s18, 4  }
 0x186   :  { %14 = sbr.rel (!%p12_p6) target bundleno = 1 (0x1), region = 84 }

</bundles_post_ra>
